<compile_context>
chip_gen: v6e
topology: v6e:2x2x1
jax: 0.10.0
libtpu: 0.0.40
codegen_flags: <defaults>
</compile_context>

<pallas_src>
import jax
import jax.numpy as jnp
from jax import lax
from jax.experimental import pallas as pl
from jax.experimental.pallas import tpu as pltpu


# ----------------------------- helpers ---------------------------------------
def _round_up(x, m):
    return (x + m - 1) // m * m


def _pick_lane_tile(HW, C_out, C_in, s_max, itemsize=4,
                    cap=2048, budget_bytes=16 * 2 ** 20):
    """Lane tile G (multiple of 128) for the flattened per-image H*W axis."""
    G = min(cap, _round_up(HW, 128))

    def footprint(g):
        go_tile = C_out * g * itemsize                 # one (C_out, g) buffer
        x_tile = g * max(C_in, 128) * itemsize         # (g, C_in), lane-padded
        gi_tile = max(C_in, 8) * g * itemsize          # (C_in, g) output tile
        # 2x for double buffering of the streamed operands (prev + cur go).
        return 2 * (2 * go_tile + max(x_tile, gi_tile))

    while G > 256 and footprint(G) > budget_bytes:
        G //= 2
    # The shifted windows reach at most s_max lanes into the previous block.
    G = max(G, _round_up(max(s_max, 1), 128))
    return G


# ------------------------------ main op ---------------------------------------
def convolution_backward_2d(grad_out, input_vec, weight):
    """Returns (grad_input, grad_weight, grad_bias), matching
    aten.convolution_backward(..., stride=1, padding=0, dilation=1, groups=1)."""
    N, C_out, OH, OW = grad_out.shape
    _, C_in, H, W = input_vec.shape
    _, _, KH, KW = weight.shape
    assert OH == H - KH + 1 and OW == W - KW + 1

    out_dtype = input_vec.dtype
    f32 = jnp.float32
    HW = H * W
    KK = KH * KW
    s_max = (KH - 1) * W + (KW - 1)

    G = _pick_lane_tile(HW, C_out, C_in, s_max)
    HWp = _round_up(HW, G)
    NB = HWp // G
    steps = N * NB
    # Shifted windows only reach one block back.
    # TODO(synk): support s_max > G (very wide rows with tiny lane tiles) by
    #             deepening the grad_out window.
    assert s_max <= G

    # grad_out zero-embedded into the full (H, W) grid, flattened per image,
    # with one leading all-zero lane block (halo for shifted windows) and a
    # zero tail up to HWp.  ~1 pass over grad_out; no transpose.
    go_emb = jnp.pad(grad_out, ((0, 0), (0, 0), (0, H - OH), (0, W - OW)))
    go_emb = go_emb.reshape(N, C_out, HW)
    p_go = jnp.pad(go_emb, ((0, 0), (0, 0), (G, HWp - HW)))   # (N, C_out, G+HWp)

    # Input in per-image NHWC-flat layout so the grad_weight contraction axis
    # (flat spatial) sits on MXU-RHS sublanes.  One pass over the input.
    x_nhwc = jnp.transpose(input_vec, (0, 2, 3, 1)).reshape(N, HW, C_in)
    x_nhwc = jnp.pad(x_nhwc, ((0, 0), (0, HWp - HW), (0, 0)))  # (N, HWp, C_in)

    # Per-(kh,kw) transposed weight slices for grad_input (tiny).
    w_t = jnp.transpose(weight, (2, 3, 1, 0)).reshape(KK, C_in, C_out)

    # ---------------- grad_weight + grad_bias kernel --------------------------
    def gw_kernel(gop_ref, goc_ref, x_ref, gw_ref, gb_ref, acc_ref, bias_ref):
        j = pl.program_id(1)

        @pl.when(j == 0)
        def _init():
            acc_ref[...] = jnp.zeros_like(acc_ref)
            bias_ref[...] = jnp.zeros_like(bias_ref)

        go_prev = gop_ref[0]                                   # (C_out, G)
        go_cur = goc_ref[0]                                    # (C_out, G)
        x_t = x_ref[0]                                         # (G, C_in)
        go_full = jnp.concatenate([go_prev, go_cur], axis=1)   # (C_out, 2G)

        # grad_bias: f32 scratch accumulation, stored once at the end.
        bias_ref[...] += jnp.sum(go_cur, axis=1, keepdims=True)

        for kh in range(KH):
            for kw in range(KW):
                s = kh * W + kw
                kk = kh * KW + kw
                go_sh = go_cur if s == 0 else go_full[:, G - s:2 * G - s]
                acc_ref[kk] += jnp.dot(go_sh, x_t, preferred_element_type=f32)

        @pl.when(j == pl.num_programs(1) - 1)
        def _store():
            gw_ref[0] = acc_ref[...].astype(gw_ref.dtype)
            gb_ref[0] = bias_ref[...].astype(gb_ref.dtype)

    gw_cost = pl.CostEstimate(
        flops=2 * KK * C_out * C_in * HWp * N + C_out * HWp * N,
        transcendentals=0,
        bytes_accessed=4 * (steps * (2 * C_out * G + G * C_in)
                            + N * (KK * C_out * C_in + C_out)),
    )
    gw_part, gb_part = pl.pallas_call(
        gw_kernel,
        out_shape=(jax.ShapeDtypeStruct((N, KK, C_out, C_in), out_dtype),
                   jax.ShapeDtypeStruct((N, C_out, 1), out_dtype)),
        grid_spec=pltpu.PrefetchScalarGridSpec(
            num_scalar_prefetch=0,
            grid=(N, NB),
            in_specs=[
                pl.BlockSpec((1, C_out, G), lambda n, j: (n, 0, j)),      # halo
                pl.BlockSpec((1, C_out, G), lambda n, j: (n, 0, j + 1)),  # cur
                pl.BlockSpec((1, G, C_in), lambda n, j: (n, j, 0)),       # input
            ],
            out_specs=(
                pl.BlockSpec((1, KK, C_out, C_in), lambda n, j: (n, 0, 0, 0)),
                pl.BlockSpec((1, C_out, 1), lambda n, j: (n, 0, 0)),
            ),
            scratch_shapes=[pltpu.VMEM((KK, C_out, C_in), f32),
                            pltpu.VMEM((C_out, 1), f32)],
        ),
        compiler_params=pltpu.CompilerParams(
            # N axis is per-image partial sums -> safe to shard across cores;
            # the HW-tile reduction axis stays last and sequential.
            dimension_semantics=("parallel", "arbitrary"),
            vmem_limit_bytes=48 * 1024 * 1024),   # <= v7x 64 MiB/TC physical
        cost_estimate=gw_cost,
    )(p_go, p_go, x_nhwc)

    grad_weight = (gw_part.sum(axis=0)          # tiny (KK, C_out, C_in) reduce
                   .transpose(1, 2, 0)
                   .reshape(C_out, C_in, KH, KW))
    grad_bias = gb_part.sum(axis=0)[:, 0]

    # ---------------- grad_input kernel ---------------------------------------
    def gi_kernel(gop_ref, goc_ref, w_ref, gi_ref):
        go_prev = gop_ref[0]                                   # (C_out, G)
        go_cur = goc_ref[0]                                    # (C_out, G)
        go_full = jnp.concatenate([go_prev, go_cur], axis=1)   # (C_out, 2G)
        acc = jnp.zeros((C_in, G), f32)
        for kh in range(KH):
            for kw in range(KW):
                s = kh * W + kw
                kk = kh * KW + kw
                go_sh = go_cur if s == 0 else go_full[:, G - s:2 * G - s]
                acc = acc + jnp.dot(w_ref[kk], go_sh, preferred_element_type=f32)
        gi_ref[0] = acc.astype(gi_ref.dtype)

    gi_cost = pl.CostEstimate(
        flops=2 * KK * C_in * C_out * HWp * N,
        transcendentals=0,
        bytes_accessed=4 * (steps * (2 * C_out * G) + KK * C_in * C_out
                            + N * C_in * HWp),
    )
    gi_flat = pl.pallas_call(
        gi_kernel,
        out_shape=jax.ShapeDtypeStruct((N, C_in, HWp), out_dtype),
        grid_spec=pltpu.PrefetchScalarGridSpec(
            num_scalar_prefetch=0,
            grid=(N, NB),
            in_specs=[
                pl.BlockSpec((1, C_out, G), lambda n, j: (n, 0, j)),      # halo
                pl.BlockSpec((1, C_out, G), lambda n, j: (n, 0, j + 1)),  # cur
                pl.BlockSpec((KK, C_in, C_out), lambda n, j: (0, 0, 0)),  # weight
            ],
            out_specs=pl.BlockSpec((1, C_in, G), lambda n, j: (n, 0, j)),
        ),
        compiler_params=pltpu.CompilerParams(
            dimension_semantics=("parallel", "parallel"),   # megacore on v7x
            vmem_limit_bytes=48 * 1024 * 1024),
        cost_estimate=gi_cost,
    )(p_go, p_go, w_t)

    grad_input = gi_flat[:, :, :HW].reshape(N, C_in, H, W)

    return grad_input, grad_weight, grad_bias


# ------------------------------ driver ----------------------------------------
if __name__ == "__main__":
    key = jax.random.PRNGKey(0)
    k1, k2, k3 = jax.random.split(key, 3)

    N, C_in, C_out = 2, 4, 8
    H = W = 16
    KH = KW = 3
    OH, OW = H - KH + 1, W - KW + 1

    input_vec = jax.random.normal(k1, (N, C_in, H, W), jnp.float32)
    weight = jax.random.normal(k2, (C_out, C_in, KH, KW), jnp.float32)
    grad_out = jax.random.normal(k3, (N, C_out, OH, OW), jnp.float32)

    gi, gw, gb = jax.jit(convolution_backward_2d)(grad_out, input_vec, weight)
    jax.block_until_ready((gi, gw, gb))

    # Cross-check against JAX autodiff of the forward convolution.
    def conv_fwd(x, w):
        return lax.conv_general_dilated(
            x, w, window_strides=(1, 1), padding="VALID",
            dimension_numbers=("NCHW", "OIHW", "NCHW"))

    _, vjp_fn = jax.vjp(conv_fwd, input_vec, weight)
    gi_ref, gw_ref = vjp_fn(grad_out)
    gb_ref = grad_out.sum(axis=(0, 2, 3))

    assert gi.shape == input_vec.shape
    assert gw.shape == weight.shape
    assert gb.shape == (C_out,)
    assert gi.dtype == input_vec.dtype and gw.dtype == weight.dtype
    assert jnp.allclose(gi, gi_ref, rtol=1e-2, atol=1e-2)
    assert jnp.allclose(gw, gw_ref, rtol=1e-2, atol=1e-2)
    assert jnp.allclose(gb, gb_ref, rtol=1e-2, atol=1e-2)

    print("KERNEL_OK")
</pallas_src>

<mosaic_0001>
module attributes {stable_mosaic.version = 11 : i64} {
  func.func @gw_kernel(%arg0: i32, %arg1: i32, %arg2: memref<1x8x256xf32, #tpu.memory_space<vmem>>, %arg3: memref<1x8x256xf32, #tpu.memory_space<vmem>>, %arg4: memref<1x256x4xf32, #tpu.memory_space<vmem>>, %arg5: memref<1x9x8x4xf32, #tpu.memory_space<vmem>>, %arg6: memref<1x8x1xf32, #tpu.memory_space<vmem>>, %arg7: memref<9x8x4xf32, #tpu.memory_space<vmem>>, %arg8: memref<8x1xf32, #tpu.memory_space<vmem>>) attributes {dimension_semantics = [#tpu.dimension_semantics<parallel>, #tpu.dimension_semantics<arbitrary>], iteration_bounds = array<i64: 2, 1>, scalar_prefetch = 0 : i64, scratch_operands = 2 : i64, tpu.core_type = #tpu.core_type<tc>, window_params = [{transform_indices = @transform_0, window_bounds = array<i64: 1, 8, 256>}, {transform_indices = @transform_1, window_bounds = array<i64: 1, 8, 256>}, {transform_indices = @transform_2, window_bounds = array<i64: 1, 256, 4>}, {transform_indices = @transform_3, window_bounds = array<i64: 1, 9, 8, 4>}, {transform_indices = @transform_4, window_bounds = array<i64: 1, 8, 1>}]} {
    %c0_i32 = arith.constant 0 : i32
    %0 = arith.cmpi eq, %arg1, %c0_i32 : i32
    %1 = arith.extui %0 : i1 to i32
    %c0_i32_0 = arith.constant 0 : i32
    %2 = arith.cmpi ne, %1, %c0_i32_0 : i32
    scf.if %2 {
      %cst_70 = arith.constant 0.000000e+00 : f32
      %89 = vector.broadcast %cst_70 : f32 to vector<9x8x4xf32>
      %c0_71 = arith.constant 0 : index
      %c0_72 = arith.constant 0 : index
      %c0_73 = arith.constant 0 : index
      %90 = vector.load %arg7[%c0_71, %c0_72, %c0_73] : memref<9x8x4xf32, #tpu.memory_space<vmem>>, vector<9x8x4xf32>
      tpu.vector_store %arg7[%c0_71, %c0_72, %c0_73], %89 {strides = array<i32>} : memref<9x8x4xf32, #tpu.memory_space<vmem>>, vector<9x8x4xf32>,
      %cst_74 = arith.constant 0.000000e+00 : f32
      %91 = vector.broadcast %cst_74 : f32 to vector<8x1xf32>
      %c0_75 = arith.constant 0 : index
      %c0_76 = arith.constant 0 : index
      %92 = vector.load %arg8[%c0_75, %c0_76] : memref<8x1xf32, #tpu.memory_space<vmem>>, vector<8x1xf32>
      tpu.vector_store %arg8[%c0_75, %c0_76], %91 {strides = array<i32>} : memref<8x1xf32, #tpu.memory_space<vmem>>, vector<8x1xf32>,
    } else {
    }
    %c0 = arith.constant 0 : index
    %c0_1 = arith.constant 0 : index
    %c0_2 = arith.constant 0 : index
    %3 = vector.load %arg2[%c0, %c0_1, %c0_2] : memref<1x8x256xf32, #tpu.memory_space<vmem>>, vector<1x8x256xf32>
    %4 = vector.shape_cast %3 : vector<1x8x256xf32> to vector<8x256xf32>
    %c0_3 = arith.constant 0 : index
    %c0_4 = arith.constant 0 : index
    %c0_5 = arith.constant 0 : index
    %5 = vector.load %arg3[%c0_3, %c0_4, %c0_5] : memref<1x8x256xf32, #tpu.memory_space<vmem>>, vector<1x8x256xf32>
    %6 = vector.shape_cast %5 : vector<1x8x256xf32> to vector<8x256xf32>
    %c0_6 = arith.constant 0 : index
    %c0_7 = arith.constant 0 : index
    %c0_8 = arith.constant 0 : index
    %7 = vector.load %arg4[%c0_6, %c0_7, %c0_8] : memref<1x256x4xf32, #tpu.memory_space<vmem>>, vector<1x256x4xf32>
    %8 = vector.shape_cast %7 : vector<1x256x4xf32> to vector<256x4xf32>
    %9 = tpu.concatenate %4, %6 in 1 : vector<8x256xf32>, vector<8x256xf32> -> vector<8x512xf32>
    %c0_9 = arith.constant 0 : index
    %c0_10 = arith.constant 0 : index
    %10 = vector.load %arg8[%c0_9, %c0_10] : memref<8x1xf32, #tpu.memory_space<vmem>>, vector<8x1xf32>
    %cst = arith.constant dense<0.000000e+00> : vector<8xf32>
    %11 = vector.multi_reduction <add>, %6, %cst [1] : vector<8x256xf32> to vector<8xf32>
    %12 = vector.shape_cast %11 : vector<8xf32> to vector<8x1xf32>
    %13 = arith.addf %10, %12 : vector<8x1xf32>
    %c0_11 = arith.constant 0 : index
    %c0_12 = arith.constant 0 : index
    %14 = vector.load %arg8[%c0_11, %c0_12] : memref<8x1xf32, #tpu.memory_space<vmem>>, vector<8x1xf32>
    tpu.vector_store %arg8[%c0_11, %c0_12], %13 {strides = array<i32>} : memref<8x1xf32, #tpu.memory_space<vmem>>, vector<8x1xf32>,
    %c0_13 = arith.constant 0 : index
    %c0_14 = arith.constant 0 : index
    %c0_15 = arith.constant 0 : index
    %15 = vector.load %arg7[%c0_13, %c0_14, %c0_15] : memref<9x8x4xf32, #tpu.memory_space<vmem>>, vector<1x8x4xf32>
    %16 = vector.shape_cast %15 : vector<1x8x4xf32> to vector<8x4xf32>
    %cst_16 = arith.constant dense<0.000000e+00> : vector<8x4xf32>
    %17 = tpu.matmul %6, %8, %cst_16 {dimension_numbers = #tpu.dot_dimension_numbers<[1], [0], [0], [1], [0, 0, 1, 1], [], []>} : vector<8x256xf32>, vector<256x4xf32>, vector<8x4xf32> -> vector<8x4xf32>
    %18 = arith.addf %16, %17 : vector<8x4xf32>
    %c0_17 = arith.constant 0 : index
    %c0_18 = arith.constant 0 : index
    %c0_19 = arith.constant 0 : index
    %19 = vector.load %arg7[%c0_17, %c0_18, %c0_19] : memref<9x8x4xf32, #tpu.memory_space<vmem>>, vector<1x8x4xf32>
    %20 = vector.shape_cast %19 : vector<1x8x4xf32> to vector<8x4xf32>
    %21 = vector.shape_cast %18 : vector<8x4xf32> to vector<1x8x4xf32>
    tpu.vector_store %arg7[%c0_17, %c0_18, %c0_19], %21 {strides = array<i32>} : memref<9x8x4xf32, #tpu.memory_space<vmem>>, vector<1x8x4xf32>,
    %22 = vector.extract_strided_slice %9 {offsets = [0, 255], sizes = [8, 256], strides = [1, 1]} : vector<8x512xf32> to vector<8x256xf32>
    %c1 = arith.constant 1 : index
    %c0_20 = arith.constant 0 : index
    %c0_21 = arith.constant 0 : index
    %23 = vector.load %arg7[%c1, %c0_20, %c0_21] : memref<9x8x4xf32, #tpu.memory_space<vmem>>, vector<1x8x4xf32>
    %24 = vector.shape_cast %23 : vector<1x8x4xf32> to vector<8x4xf32>
    %cst_22 = arith.constant dense<0.000000e+00> : vector<8x4xf32>
    %25 = tpu.matmul %22, %8, %cst_22 {dimension_numbers = #tpu.dot_dimension_numbers<[1], [0], [0], [1], [0, 0, 1, 1], [], []>} : vector<8x256xf32>, vector<256x4xf32>, vector<8x4xf32> -> vector<8x4xf32>
    %26 = arith.addf %24, %25 : vector<8x4xf32>
    %c1_23 = arith.constant 1 : index
    %c0_24 = arith.constant 0 : index
    %c0_25 = arith.constant 0 : index
    %27 = vector.load %arg7[%c1_23, %c0_24, %c0_25] : memref<9x8x4xf32, #tpu.memory_space<vmem>>, vector<1x8x4xf32>
    %28 = vector.shape_cast %27 : vector<1x8x4xf32> to vector<8x4xf32>
    %29 = vector.shape_cast %26 : vector<8x4xf32> to vector<1x8x4xf32>
    tpu.vector_store %arg7[%c1_23, %c0_24, %c0_25], %29 {strides = array<i32>} : memref<9x8x4xf32, #tpu.memory_space<vmem>>, vector<1x8x4xf32>,
    %30 = vector.extract_strided_slice %9 {offsets = [0, 254], sizes = [8, 256], strides = [1, 1]} : vector<8x512xf32> to vector<8x256xf32>
    %c2 = arith.constant 2 : index
    %c0_26 = arith.constant 0 : index
    %c0_27 = arith.constant 0 : index
    %31 = vector.load %arg7[%c2, %c0_26, %c0_27] : memref<9x8x4xf32, #tpu.memory_space<vmem>>, vector<1x8x4xf32>
    %32 = vector.shape_cast %31 : vector<1x8x4xf32> to vector<8x4xf32>
    %cst_28 = arith.constant dense<0.000000e+00> : vector<8x4xf32>
    %33 = tpu.matmul %30, %8, %cst_28 {dimension_numbers = #tpu.dot_dimension_numbers<[1], [0], [0], [1], [0, 0, 1, 1], [], []>} : vector<8x256xf32>, vector<256x4xf32>, vector<8x4xf32> -> vector<8x4xf32>
    %34 = arith.addf %32, %33 : vector<8x4xf32>
    %c2_29 = arith.constant 2 : index
    %c0_30 = arith.constant 0 : index
    %c0_31 = arith.constant 0 : index
    %35 = vector.load %arg7[%c2_29, %c0_30, %c0_31] : memref<9x8x4xf32, #tpu.memory_space<vmem>>, vector<1x8x4xf32>
    %36 = vector.shape_cast %35 : vector<1x8x4xf32> to vector<8x4xf32>
    %37 = vector.shape_cast %34 : vector<8x4xf32> to vector<1x8x4xf32>
    tpu.vector_store %arg7[%c2_29, %c0_30, %c0_31], %37 {strides = array<i32>} : memref<9x8x4xf32, #tpu.memory_space<vmem>>, vector<1x8x4xf32>,
    %38 = vector.extract_strided_slice %9 {offsets = [0, 240], sizes = [8, 256], strides = [1, 1]} : vector<8x512xf32> to vector<8x256xf32>
    %c3 = arith.constant 3 : index
    %c0_32 = arith.constant 0 : index
    %c0_33 = arith.constant 0 : index
    %39 = vector.load %arg7[%c3, %c0_32, %c0_33] : memref<9x8x4xf32, #tpu.memory_space<vmem>>, vector<1x8x4xf32>
    %40 = vector.shape_cast %39 : vector<1x8x4xf32> to vector<8x4xf32>
    %cst_34 = arith.constant dense<0.000000e+00> : vector<8x4xf32>
    %41 = tpu.matmul %38, %8, %cst_34 {dimension_numbers = #tpu.dot_dimension_numbers<[1], [0], [0], [1], [0, 0, 1, 1], [], []>} : vector<8x256xf32>, vector<256x4xf32>, vector<8x4xf32> -> vector<8x4xf32>
    %42 = arith.addf %40, %41 : vector<8x4xf32>
    %c3_35 = arith.constant 3 : index
    %c0_36 = arith.constant 0 : index
    %c0_37 = arith.constant 0 : index
    %43 = vector.load %arg7[%c3_35, %c0_36, %c0_37] : memref<9x8x4xf32, #tpu.memory_space<vmem>>, vector<1x8x4xf32>
    %44 = vector.shape_cast %43 : vector<1x8x4xf32> to vector<8x4xf32>
    %45 = vector.shape_cast %42 : vector<8x4xf32> to vector<1x8x4xf32>
    tpu.vector_store %arg7[%c3_35, %c0_36, %c0_37], %45 {strides = array<i32>} : memref<9x8x4xf32, #tpu.memory_space<vmem>>, vector<1x8x4xf32>,
    %46 = vector.extract_strided_slice %9 {offsets = [0, 239], sizes = [8, 256], strides = [1, 1]} : vector<8x512xf32> to vector<8x256xf32>
    %c4 = arith.constant 4 : index
    %c0_38 = arith.constant 0 : index
    %c0_39 = arith.constant 0 : index
    %47 = vector.load %arg7[%c4, %c0_38, %c0_39] : memref<9x8x4xf32, #tpu.memory_space<vmem>>, vector<1x8x4xf32>
    %48 = vector.shape_cast %47 : vector<1x8x4xf32> to vector<8x4xf32>
    %cst_40 = arith.constant dense<0.000000e+00> : vector<8x4xf32>
    %49 = tpu.matmul %46, %8, %cst_40 {dimension_numbers = #tpu.dot_dimension_numbers<[1], [0], [0], [1], [0, 0, 1, 1], [], []>} : vector<8x256xf32>, vector<256x4xf32>, vector<8x4xf32> -> vector<8x4xf32>
    %50 = arith.addf %48, %49 : vector<8x4xf32>
    %c4_41 = arith.constant 4 : index
    %c0_42 = arith.constant 0 : index
    %c0_43 = arith.constant 0 : index
    %51 = vector.load %arg7[%c4_41, %c0_42, %c0_43] : memref<9x8x4xf32, #tpu.memory_space<vmem>>, vector<1x8x4xf32>
    %52 = vector.shape_cast %51 : vector<1x8x4xf32> to vector<8x4xf32>
    %53 = vector.shape_cast %50 : vector<8x4xf32> to vector<1x8x4xf32>
    tpu.vector_store %arg7[%c4_41, %c0_42, %c0_43], %53 {strides = array<i32>} : memref<9x8x4xf32, #tpu.memory_space<vmem>>, vector<1x8x4xf32>,
    %54 = vector.extract_strided_slice %9 {offsets = [0, 238], sizes = [8, 256], strides = [1, 1]} : vector<8x512xf32> to vector<8x256xf32>
    %c5 = arith.constant 5 : index
    %c0_44 = arith.constant 0 : index
    %c0_45 = arith.constant 0 : index
    %55 = vector.load %arg7[%c5, %c0_44, %c0_45] : memref<9x8x4xf32, #tpu.memory_space<vmem>>, vector<1x8x4xf32>
    %56 = vector.shape_cast %55 : vector<1x8x4xf32> to vector<8x4xf32>
    %cst_46 = arith.constant dense<0.000000e+00> : vector<8x4xf32>
    %57 = tpu.matmul %54, %8, %cst_46 {dimension_numbers = #tpu.dot_dimension_numbers<[1], [0], [0], [1], [0, 0, 1, 1], [], []>} : vector<8x256xf32>, vector<256x4xf32>, vector<8x4xf32> -> vector<8x4xf32>
    %58 = arith.addf %56, %57 : vector<8x4xf32>
    %c5_47 = arith.constant 5 : index
    %c0_48 = arith.constant 0 : index
    %c0_49 = arith.constant 0 : index
    %59 = vector.load %arg7[%c5_47, %c0_48, %c0_49] : memref<9x8x4xf32, #tpu.memory_space<vmem>>, vector<1x8x4xf32>
    %60 = vector.shape_cast %59 : vector<1x8x4xf32> to vector<8x4xf32>
    %61 = vector.shape_cast %58 : vector<8x4xf32> to vector<1x8x4xf32>
    tpu.vector_store %arg7[%c5_47, %c0_48, %c0_49], %61 {strides = array<i32>} : memref<9x8x4xf32, #tpu.memory_space<vmem>>, vector<1x8x4xf32>,
    %62 = vector.extract_strided_slice %9 {offsets = [0, 224], sizes = [8, 256], strides = [1, 1]} : vector<8x512xf32> to vector<8x256xf32>
    %c6 = arith.constant 6 : index
    %c0_50 = arith.constant 0 : index
    %c0_51 = arith.constant 0 : index
    %63 = vector.load %arg7[%c6, %c0_50, %c0_51] : memref<9x8x4xf32, #tpu.memory_space<vmem>>, vector<1x8x4xf32>
    %64 = vector.shape_cast %63 : vector<1x8x4xf32> to vector<8x4xf32>
    %cst_52 = arith.constant dense<0.000000e+00> : vector<8x4xf32>
    %65 = tpu.matmul %62, %8, %cst_52 {dimension_numbers = #tpu.dot_dimension_numbers<[1], [0], [0], [1], [0, 0, 1, 1], [], []>} : vector<8x256xf32>, vector<256x4xf32>, vector<8x4xf32> -> vector<8x4xf32>
    %66 = arith.addf %64, %65 : vector<8x4xf32>
    %c6_53 = arith.constant 6 : index
    %c0_54 = arith.constant 0 : index
    %c0_55 = arith.constant 0 : index
    %67 = vector.load %arg7[%c6_53, %c0_54, %c0_55] : memref<9x8x4xf32, #tpu.memory_space<vmem>>, vector<1x8x4xf32>
    %68 = vector.shape_cast %67 : vector<1x8x4xf32> to vector<8x4xf32>
    %69 = vector.shape_cast %66 : vector<8x4xf32> to vector<1x8x4xf32>
    tpu.vector_store %arg7[%c6_53, %c0_54, %c0_55], %69 {strides = array<i32>} : memref<9x8x4xf32, #tpu.memory_space<vmem>>, vector<1x8x4xf32>,
    %70 = vector.extract_strided_slice %9 {offsets = [0, 223], sizes = [8, 256], strides = [1, 1]} : vector<8x512xf32> to vector<8x256xf32>
    %c7 = arith.constant 7 : index
    %c0_56 = arith.constant 0 : index
    %c0_57 = arith.constant 0 : index
    %71 = vector.load %arg7[%c7, %c0_56, %c0_57] : memref<9x8x4xf32, #tpu.memory_space<vmem>>, vector<1x8x4xf32>
    %72 = vector.shape_cast %71 : vector<1x8x4xf32> to vector<8x4xf32>
    %cst_58 = arith.constant dense<0.000000e+00> : vector<8x4xf32>
    %73 = tpu.matmul %70, %8, %cst_58 {dimension_numbers = #tpu.dot_dimension_numbers<[1], [0], [0], [1], [0, 0, 1, 1], [], []>} : vector<8x256xf32>, vector<256x4xf32>, vector<8x4xf32> -> vector<8x4xf32>
    %74 = arith.addf %72, %73 : vector<8x4xf32>
    %c7_59 = arith.constant 7 : index
    %c0_60 = arith.constant 0 : index
    %c0_61 = arith.constant 0 : index
    %75 = vector.load %arg7[%c7_59, %c0_60, %c0_61] : memref<9x8x4xf32, #tpu.memory_space<vmem>>, vector<1x8x4xf32>
    %76 = vector.shape_cast %75 : vector<1x8x4xf32> to vector<8x4xf32>
    %77 = vector.shape_cast %74 : vector<8x4xf32> to vector<1x8x4xf32>
    tpu.vector_store %arg7[%c7_59, %c0_60, %c0_61], %77 {strides = array<i32>} : memref<9x8x4xf32, #tpu.memory_space<vmem>>, vector<1x8x4xf32>,
    %78 = vector.extract_strided_slice %9 {offsets = [0, 222], sizes = [8, 256], strides = [1, 1]} : vector<8x512xf32> to vector<8x256xf32>
    %c8 = arith.constant 8 : index
    %c0_62 = arith.constant 0 : index
    %c0_63 = arith.constant 0 : index
    %79 = vector.load %arg7[%c8, %c0_62, %c0_63] : memref<9x8x4xf32, #tpu.memory_space<vmem>>, vector<1x8x4xf32>
    %80 = vector.shape_cast %79 : vector<1x8x4xf32> to vector<8x4xf32>
    %cst_64 = arith.constant dense<0.000000e+00> : vector<8x4xf32>
    %81 = tpu.matmul %78, %8, %cst_64 {dimension_numbers = #tpu.dot_dimension_numbers<[1], [0], [0], [1], [0, 0, 1, 1], [], []>} : vector<8x256xf32>, vector<256x4xf32>, vector<8x4xf32> -> vector<8x4xf32>
    %82 = arith.addf %80, %81 : vector<8x4xf32>
    %c8_65 = arith.constant 8 : index
    %c0_66 = arith.constant 0 : index
    %c0_67 = arith.constant 0 : index
    %83 = vector.load %arg7[%c8_65, %c0_66, %c0_67] : memref<9x8x4xf32, #tpu.memory_space<vmem>>, vector<1x8x4xf32>
    %84 = vector.shape_cast %83 : vector<1x8x4xf32> to vector<8x4xf32>
    %85 = vector.shape_cast %82 : vector<8x4xf32> to vector<1x8x4xf32>
    tpu.vector_store %arg7[%c8_65, %c0_66, %c0_67], %85 {strides = array<i32>} : memref<9x8x4xf32, #tpu.memory_space<vmem>>, vector<1x8x4xf32>,
    %c0_i32_68 = arith.constant 0 : i32
    %86 = arith.cmpi eq, %arg1, %c0_i32_68 : i32
    %87 = arith.extui %86 : i1 to i32
    %c0_i32_69 = arith.constant 0 : i32
    %88 = arith.cmpi ne, %87, %c0_i32_69 : i32
    scf.if %88 {
      %c0_70 = arith.constant 0 : index
      %c0_71 = arith.constant 0 : index
      %c0_72 = arith.constant 0 : index
      %89 = vector.load %arg7[%c0_70, %c0_71, %c0_72] : memref<9x8x4xf32, #tpu.memory_space<vmem>>, vector<9x8x4xf32>
      %c0_73 = arith.constant 0 : index
      %c0_74 = arith.constant 0 : index
      %c0_75 = arith.constant 0 : index
      %c0_76 = arith.constant 0 : index
      %90 = vector.load %arg5[%c0_73, %c0_74, %c0_75, %c0_76] : memref<1x9x8x4xf32, #tpu.memory_space<vmem>>, vector<1x9x8x4xf32>
      %91 = vector.shape_cast %90 : vector<1x9x8x4xf32> to vector<9x8x4xf32>
      %92 = vector.shape_cast %89 : vector<9x8x4xf32> to vector<1x9x8x4xf32>
      tpu.vector_store %arg5[%c0_73, %c0_74, %c0_75, %c0_76], %92 {strides = array<i32>} : memref<1x9x8x4xf32, #tpu.memory_space<vmem>>, vector<1x9x8x4xf32>,
      %c0_77 = arith.constant 0 : index
      %c0_78 = arith.constant 0 : index
      %93 = vector.load %arg8[%c0_77, %c0_78] : memref<8x1xf32, #tpu.memory_space<vmem>>, vector<8x1xf32>
      %c0_79 = arith.constant 0 : index
      %c0_80 = arith.constant 0 : index
      %c0_81 = arith.constant 0 : index
      %94 = vector.load %arg6[%c0_79, %c0_80, %c0_81] : memref<1x8x1xf32, #tpu.memory_space<vmem>>, vector<1x8x1xf32>
      %95 = vector.shape_cast %94 : vector<1x8x1xf32> to vector<8x1xf32>
      %96 = vector.shape_cast %93 : vector<8x1xf32> to vector<1x8x1xf32>
      tpu.vector_store %arg6[%c0_79, %c0_80, %c0_81], %96 {strides = array<i32>} : memref<1x8x1xf32, #tpu.memory_space<vmem>>, vector<1x8x1xf32>,
    } else {
    }
    return
  }
  func.func @transform_0(%arg0: i32, %arg1: i32) -> (i32, i32, i32) {
    %c0_i32 = arith.constant 0 : i32
    %c0_i32_0 = arith.constant 0 : i32
    return %arg0, %c0_i32, %arg1 : i32, i32, i32
  }
  func.func @transform_1(%arg0: i32, %arg1: i32) -> (i32, i32, i32) {
    %c1_i32 = arith.constant 1 : i32
    %0 = arith.addi %arg1, %c1_i32 : i32
    %c0_i32 = arith.constant 0 : i32
    %c0_i32_0 = arith.constant 0 : i32
    return %arg0, %c0_i32, %0 : i32, i32, i32
  }
  func.func @transform_2(%arg0: i32, %arg1: i32) -> (i32, i32, i32) {
    %c0_i32 = arith.constant 0 : i32
    %c0_i32_0 = arith.constant 0 : i32
    return %arg0, %arg1, %c0_i32 : i32, i32, i32
  }
  func.func @transform_3(%arg0: i32, %arg1: i32) -> (i32, i32, i32, i32) {
    %c0_i32 = arith.constant 0 : i32
    %c0_i32_0 = arith.constant 0 : i32
    %c0_i32_1 = arith.constant 0 : i32
    %c0_i32_2 = arith.constant 0 : i32
    return %arg0, %c0_i32, %c0_i32_0, %c0_i32_1 : i32, i32, i32, i32
  }
  func.func @transform_4(%arg0: i32, %arg1: i32) -> (i32, i32, i32) {
    %c0_i32 = arith.constant 0 : i32
    %c0_i32_0 = arith.constant 0 : i32
    %c0_i32_1 = arith.constant 0 : i32
    return %arg0, %c0_i32, %c0_i32_0 : i32, i32, i32
  }
}

module attributes {stable_mosaic.version = 11 : i64} {
  func.func @gi_kernel(%arg0: i32, %arg1: i32, %arg2: memref<1x8x256xf32, #tpu.memory_space<vmem>>, %arg3: memref<1x8x256xf32, #tpu.memory_space<vmem>>, %arg4: memref<9x4x8xf32, #tpu.memory_space<vmem>>, %arg5: memref<1x4x256xf32, #tpu.memory_space<vmem>>) attributes {dimension_semantics = [#tpu.dimension_semantics<parallel>, #tpu.dimension_semantics<parallel>], iteration_bounds = array<i64: 2, 1>, scalar_prefetch = 0 : i64, scratch_operands = 0 : i64, tpu.core_type = #tpu.core_type<tc>, window_params = [{transform_indices = @transform_0, window_bounds = array<i64: 1, 8, 256>}, {transform_indices = @transform_1, window_bounds = array<i64: 1, 8, 256>}, {pipeline_mode = #tpu.pipeline_mode<synchronous>, transform_indices = @transform_2, window_bounds = array<i64: 9, 4, 8>}, {transform_indices = @transform_3, window_bounds = array<i64: 1, 4, 256>}]} {
    %c0 = arith.constant 0 : index
    %c0_0 = arith.constant 0 : index
    %c0_1 = arith.constant 0 : index
    %0 = vector.load %arg2[%c0, %c0_0, %c0_1] : memref<1x8x256xf32, #tpu.memory_space<vmem>>, vector<1x8x256xf32>
    %1 = vector.shape_cast %0 : vector<1x8x256xf32> to vector<8x256xf32>
    %c0_2 = arith.constant 0 : index
    %c0_3 = arith.constant 0 : index
    %c0_4 = arith.constant 0 : index
    %2 = vector.load %arg3[%c0_2, %c0_3, %c0_4] : memref<1x8x256xf32, #tpu.memory_space<vmem>>, vector<1x8x256xf32>
    %3 = vector.shape_cast %2 : vector<1x8x256xf32> to vector<8x256xf32>
    %4 = tpu.concatenate %1, %3 in 1 : vector<8x256xf32>, vector<8x256xf32> -> vector<8x512xf32>
    %cst = arith.constant 0.000000e+00 : f32
    %5 = vector.broadcast %cst : f32 to vector<4x256xf32>
    %c0_5 = arith.constant 0 : index
    %c0_6 = arith.constant 0 : index
    %c0_7 = arith.constant 0 : index
    %6 = vector.load %arg4[%c0_5, %c0_6, %c0_7] : memref<9x4x8xf32, #tpu.memory_space<vmem>>, vector<1x4x8xf32>
    %7 = vector.shape_cast %6 : vector<1x4x8xf32> to vector<4x8xf32>
    %cst_8 = arith.constant dense<0.000000e+00> : vector<4x256xf32>
    %8 = tpu.matmul %7, %3, %cst_8 {dimension_numbers = #tpu.dot_dimension_numbers<[1], [0], [0], [1], [0, 0, 1, 1], [], []>} : vector<4x8xf32>, vector<8x256xf32>, vector<4x256xf32> -> vector<4x256xf32>
    %9 = arith.addf %5, %8 : vector<4x256xf32>
    %10 = vector.extract_strided_slice %4 {offsets = [0, 255], sizes = [8, 256], strides = [1, 1]} : vector<8x512xf32> to vector<8x256xf32>
    %c1 = arith.constant 1 : index
    %c0_9 = arith.constant 0 : index
    %c0_10 = arith.constant 0 : index
    %11 = vector.load %arg4[%c1, %c0_9, %c0_10] : memref<9x4x8xf32, #tpu.memory_space<vmem>>, vector<1x4x8xf32>
    %12 = vector.shape_cast %11 : vector<1x4x8xf32> to vector<4x8xf32>
    %cst_11 = arith.constant dense<0.000000e+00> : vector<4x256xf32>
    %13 = tpu.matmul %12, %10, %cst_11 {dimension_numbers = #tpu.dot_dimension_numbers<[1], [0], [0], [1], [0, 0, 1, 1], [], []>} : vector<4x8xf32>, vector<8x256xf32>, vector<4x256xf32> -> vector<4x256xf32>
    %14 = arith.addf %9, %13 : vector<4x256xf32>
    %15 = vector.extract_strided_slice %4 {offsets = [0, 254], sizes = [8, 256], strides = [1, 1]} : vector<8x512xf32> to vector<8x256xf32>
    %c2 = arith.constant 2 : index
    %c0_12 = arith.constant 0 : index
    %c0_13 = arith.constant 0 : index
    %16 = vector.load %arg4[%c2, %c0_12, %c0_13] : memref<9x4x8xf32, #tpu.memory_space<vmem>>, vector<1x4x8xf32>
    %17 = vector.shape_cast %16 : vector<1x4x8xf32> to vector<4x8xf32>
    %cst_14 = arith.constant dense<0.000000e+00> : vector<4x256xf32>
    %18 = tpu.matmul %17, %15, %cst_14 {dimension_numbers = #tpu.dot_dimension_numbers<[1], [0], [0], [1], [0, 0, 1, 1], [], []>} : vector<4x8xf32>, vector<8x256xf32>, vector<4x256xf32> -> vector<4x256xf32>
    %19 = arith.addf %14, %18 : vector<4x256xf32>
    %20 = vector.extract_strided_slice %4 {offsets = [0, 240], sizes = [8, 256], strides = [1, 1]} : vector<8x512xf32> to vector<8x256xf32>
    %c3 = arith.constant 3 : index
    %c0_15 = arith.constant 0 : index
    %c0_16 = arith.constant 0 : index
    %21 = vector.load %arg4[%c3, %c0_15, %c0_16] : memref<9x4x8xf32, #tpu.memory_space<vmem>>, vector<1x4x8xf32>
    %22 = vector.shape_cast %21 : vector<1x4x8xf32> to vector<4x8xf32>
    %cst_17 = arith.constant dense<0.000000e+00> : vector<4x256xf32>
    %23 = tpu.matmul %22, %20, %cst_17 {dimension_numbers = #tpu.dot_dimension_numbers<[1], [0], [0], [1], [0, 0, 1, 1], [], []>} : vector<4x8xf32>, vector<8x256xf32>, vector<4x256xf32> -> vector<4x256xf32>
    %24 = arith.addf %19, %23 : vector<4x256xf32>
    %25 = vector.extract_strided_slice %4 {offsets = [0, 239], sizes = [8, 256], strides = [1, 1]} : vector<8x512xf32> to vector<8x256xf32>
    %c4 = arith.constant 4 : index
    %c0_18 = arith.constant 0 : index
    %c0_19 = arith.constant 0 : index
    %26 = vector.load %arg4[%c4, %c0_18, %c0_19] : memref<9x4x8xf32, #tpu.memory_space<vmem>>, vector<1x4x8xf32>
    %27 = vector.shape_cast %26 : vector<1x4x8xf32> to vector<4x8xf32>
    %cst_20 = arith.constant dense<0.000000e+00> : vector<4x256xf32>
    %28 = tpu.matmul %27, %25, %cst_20 {dimension_numbers = #tpu.dot_dimension_numbers<[1], [0], [0], [1], [0, 0, 1, 1], [], []>} : vector<4x8xf32>, vector<8x256xf32>, vector<4x256xf32> -> vector<4x256xf32>
    %29 = arith.addf %24, %28 : vector<4x256xf32>
    %30 = vector.extract_strided_slice %4 {offsets = [0, 238], sizes = [8, 256], strides = [1, 1]} : vector<8x512xf32> to vector<8x256xf32>
    %c5 = arith.constant 5 : index
    %c0_21 = arith.constant 0 : index
    %c0_22 = arith.constant 0 : index
    %31 = vector.load %arg4[%c5, %c0_21, %c0_22] : memref<9x4x8xf32, #tpu.memory_space<vmem>>, vector<1x4x8xf32>
    %32 = vector.shape_cast %31 : vector<1x4x8xf32> to vector<4x8xf32>
    %cst_23 = arith.constant dense<0.000000e+00> : vector<4x256xf32>
    %33 = tpu.matmul %32, %30, %cst_23 {dimension_numbers = #tpu.dot_dimension_numbers<[1], [0], [0], [1], [0, 0, 1, 1], [], []>} : vector<4x8xf32>, vector<8x256xf32>, vector<4x256xf32> -> vector<4x256xf32>
    %34 = arith.addf %29, %33 : vector<4x256xf32>
    %35 = vector.extract_strided_slice %4 {offsets = [0, 224], sizes = [8, 256], strides = [1, 1]} : vector<8x512xf32> to vector<8x256xf32>
    %c6 = arith.constant 6 : index
    %c0_24 = arith.constant 0 : index
    %c0_25 = arith.constant 0 : index
    %36 = vector.load %arg4[%c6, %c0_24, %c0_25] : memref<9x4x8xf32, #tpu.memory_space<vmem>>, vector<1x4x8xf32>
    %37 = vector.shape_cast %36 : vector<1x4x8xf32> to vector<4x8xf32>
    %cst_26 = arith.constant dense<0.000000e+00> : vector<4x256xf32>
    %38 = tpu.matmul %37, %35, %cst_26 {dimension_numbers = #tpu.dot_dimension_numbers<[1], [0], [0], [1], [0, 0, 1, 1], [], []>} : vector<4x8xf32>, vector<8x256xf32>, vector<4x256xf32> -> vector<4x256xf32>
    %39 = arith.addf %34, %38 : vector<4x256xf32>
    %40 = vector.extract_strided_slice %4 {offsets = [0, 223], sizes = [8, 256], strides = [1, 1]} : vector<8x512xf32> to vector<8x256xf32>
    %c7 = arith.constant 7 : index
    %c0_27 = arith.constant 0 : index
    %c0_28 = arith.constant 0 : index
    %41 = vector.load %arg4[%c7, %c0_27, %c0_28] : memref<9x4x8xf32, #tpu.memory_space<vmem>>, vector<1x4x8xf32>
    %42 = vector.shape_cast %41 : vector<1x4x8xf32> to vector<4x8xf32>
    %cst_29 = arith.constant dense<0.000000e+00> : vector<4x256xf32>
    %43 = tpu.matmul %42, %40, %cst_29 {dimension_numbers = #tpu.dot_dimension_numbers<[1], [0], [0], [1], [0, 0, 1, 1], [], []>} : vector<4x8xf32>, vector<8x256xf32>, vector<4x256xf32> -> vector<4x256xf32>
    %44 = arith.addf %39, %43 : vector<4x256xf32>
    %45 = vector.extract_strided_slice %4 {offsets = [0, 222], sizes = [8, 256], strides = [1, 1]} : vector<8x512xf32> to vector<8x256xf32>
    %c8 = arith.constant 8 : index
    %c0_30 = arith.constant 0 : index
    %c0_31 = arith.constant 0 : index
    %46 = vector.load %arg4[%c8, %c0_30, %c0_31] : memref<9x4x8xf32, #tpu.memory_space<vmem>>, vector<1x4x8xf32>
    %47 = vector.shape_cast %46 : vector<1x4x8xf32> to vector<4x8xf32>
    %cst_32 = arith.constant dense<0.000000e+00> : vector<4x256xf32>
    %48 = tpu.matmul %47, %45, %cst_32 {dimension_numbers = #tpu.dot_dimension_numbers<[1], [0], [0], [1], [0, 0, 1, 1], [], []>} : vector<4x8xf32>, vector<8x256xf32>, vector<4x256xf32> -> vector<4x256xf32>
    %49 = arith.addf %44, %48 : vector<4x256xf32>
    %c0_33 = arith.constant 0 : index
    %c0_34 = arith.constant 0 : index
    %c0_35 = arith.constant 0 : index
    %50 = vector.load %arg5[%c0_33, %c0_34, %c0_35] : memref<1x4x256xf32, #tpu.memory_space<vmem>>, vector<1x4x256xf32>
    %51 = vector.shape_cast %50 : vector<1x4x256xf32> to vector<4x256xf32>
    %52 = vector.shape_cast %49 : vector<4x256xf32> to vector<1x4x256xf32>
    tpu.vector_store %arg5[%c0_33, %c0_34, %c0_35], %52 {strides = array<i32>} : memref<1x4x256xf32, #tpu.memory_space<vmem>>, vector<1x4x256xf32>,
    return
  }
  func.func @transform_0(%arg0: i32, %arg1: i32) -> (i32, i32, i32) {
    %c0_i32 = arith.constant 0 : i32
    %c0_i32_0 = arith.constant 0 : i32
    return %arg0, %c0_i32, %arg1 : i32, i32, i32
  }
  func.func @transform_1(%arg0: i32, %arg1: i32) -> (i32, i32, i32) {
    %c1_i32 = arith.constant 1 : i32
    %0 = arith.addi %arg1, %c1_i32 : i32
    %c0_i32 = arith.constant 0 : i32
    %c0_i32_0 = arith.constant 0 : i32
    return %arg0, %c0_i32, %0 : i32, i32, i32
  }
  func.func @transform_2(%arg0: i32, %arg1: i32) -> (i32, i32, i32) {
    %c0_i32 = arith.constant 0 : i32
    %c0_i32_0 = arith.constant 0 : i32
    %c0_i32_1 = arith.constant 0 : i32
    %c0_i32_2 = arith.constant 0 : i32
    return %c0_i32, %c0_i32_0, %c0_i32_1 : i32, i32, i32
  }
  func.func @transform_3(%arg0: i32, %arg1: i32) -> (i32, i32, i32) {
    %c0_i32 = arith.constant 0 : i32
    %c0_i32_0 = arith.constant 0 : i32
    return %arg0, %c0_i32, %arg1 : i32, i32, i32
  }
}

</mosaic_0001>

<bundles_post_ra>
// kernel: convolution_backward_2d.2
= control target key start
LH: loop header
LB: loop body
LE: loop exit
PB: predicated region body
PF: predicated region fallthrough
CT: control target
= control target key end

     0   :  { %s1756_s15 = smov 0   ;;  %s1758_s16 = smov 0   ;;  %s2265_s0 = inlined_call_operand.vmem [shape: f32[2,8,512], index: 0, kind: input, shape index: {}, may-alias: {0,1}]   ;;  %s2266_s1 = inlined_call_operand.vmem [shape: f32[2,8,512], index: 1, kind: input, shape index: {}, may-alias: {0,1}]   ;;  %s2267_s2 = inlined_call_operand.vmem [shape: f32[2,256,4], index: 2, kind: input, shape index: {}]   ;;  %s2268_s3 = inlined_call_operand.vmem [shape: f32[2,9,8,4], index: 3, kind: output, shape index: {0}]   ;;  %s2269_s4 = inlined_call_operand.vmem [shape: f32[2,8,1], index: 4, kind: output, shape index: {1}]  }
   0x1   :  { %s1760_s17 = smov 0  }
   0x2 LB: > { %s27_s18 = sadd.s32 1, %s1716_s16  ;;  %p1293_p0 = scmp.ge.s32.totalorder %s1720_s17, 1  ;;  %s1720_s17 = sphi %s1760_s17, %s15_s17   ;;  %s1716_s16 = sphi %s1758_s16, %s2271_s16   ;;  %s1712_s15 = sphi %s1756_s15, %s2270_s15  }
   0x3   : > { %p29_p1 = scmp.ge.s32.totalorder %s27_s18, 2  ;;  %p222_p2 = scmp.lt.s32.totalorder %s1720_s17, 3 }
   0x5   : > { %s2273_s18 = smov (%p29_p1, %s27_s18), 0  ;;  %p223_p3 = pnand %p1293_p0, %p222_p2 }
   0x6   : > { %p276_p4 = scmp.lt.s32.totalorder (!%p223_p3), %s1712_s15, 1  ;;  %s1722_s5 = smov (!%p223_p3), 1  }
   0x7   : > { %226 = sbr.rel (%p223_p3) target bundleno = 451 (0x1c3), region = 32  ;;  %s1723_s6 = smov (!%p223_p3), 2  }
   0x8   : > { %s1724_s7 = smov (!%p223_p3), 17   ;;  %s1725_s8 = smov (!%p223_p3), 16  }
   0x9   : > { %s1726_s9 = smov (!%p223_p3), 32   ;;  %s1727_s10 = smov (!%p223_p3), 18  }
   0xa   : > { %s1728_s11 = smov (!%p223_p3), 34   ;;  %s1729_s12 = smov (!%p223_p3), 33  }
   0xc   : > { %s2275_s15 = smov (!%p276_p4, %s1712_s15), 1  ;;  %vm330_vm0 = vcmask 7168   ;;  %vm320_vm1 = vcmask 31744   ;;  %v1730_v37 = vmov 0.0   ;;  %vm543_vm2 = vcmask 15360  }
   0xd   : > { %s1304_s19 = sshll.u32 %s2275_s15, 5  ;;  %s1307_s20 = sshll.u32 %s2275_s15, 8  ;;  %321 = vst.msk [vmem:[#allocation2] sm:$0xff] %vm320_vm1, %v1730_v37  ;;  %322 = vst.msk [vmem:[#allocation2 + $0x8] sm:$0xff] %vm320_vm1, %v1730_v37  ;;  %vm628_vm3 = vcmask 130048   ;;  %vm713_vm4 = vcmask 138240  }
   0xe   : > { %s1306_s21 = sadd.s32 16, %s1304_s19  ;;  %s1781_s24 = scalar_lea.vmem %s2267_s2, %s1307_s20  ;;  %323 = vst.msk [vmem:[#allocation2 + $0x10] sm:$0xff] %vm320_vm1, %v1730_v37  ;;  %324 = vst.msk [vmem:[#allocation2 + $0x18] sm:$0xff] %vm320_vm1, %v1730_v37  ;;  %vm798_vm5 = vcmask 146432   ;;  %vm883_vm6 = vcmask 261120   ;;  %vm968_vm7 = vcmask 269312  }
   0xf   : > { %s294_s27 = scalar_lea.vmem %s2266_s1, %s1306_s21  ;;  %v1787_v0 = vld [vmem:[%s1781_s24 + $0xf8] sm:$0xff]  ;;  %v1793_v2 = vld [vmem:[%s1781_s24 + $0xf0] sm:$0xff]  ;;  %s283_s30 = scalar_lea.vmem %s2265_s0, %s1304_s19  ;;  %v1815_v8 = vld [vmem:[%s1781_s24 + $0xe8] sm:$0xff]  ;;  %325 = vst.msk [vmem:[#allocation2 + $0x20] sm:$0xff] %vm320_vm1, %v1730_v37  ;;  %vm1053_vm8 = vcmask 277504  }
  0x10   : > { %v1790_v1 = vld [vmem:[%s1781_s24 + $0x78] sm:$0xff]  ;;  %v1795_v3 = vld [vmem:[%s294_s27] sm:$0xff]  ;;  %v1797_v4 = vld [vmem:[%s294_s27 + $0x8] sm:$0xff]  ;;  %1309 = vmatprep.subr.mxu0 %v1787_v0  ;;  %1344 = vmatprep.subr.mxu1 %v1787_v0  ;;  %326 = vst.msk [vmem:[#allocation2 + $0x28] sm:$0xff] %vm320_vm1, %v1730_v37  ;;  %s1624_s13 = smul.u32 72, %s2275_s15  ;;  %s1301_s21 = sshll.u32 %s2275_s15, 3 }
  0x11   : > { %v1804_v5 = vld [vmem:[%s1781_s24 + $0x70] sm:$0xff]  ;;  %v1809_v6 = vpack.i.bf16 %v1797_v4, %v1795_v3  ;;  %v1811_v7 = vld [vmem:[%s283_s30 + $0x8] sm:$0xff]  ;;  %1310 = vmatpush3.msra.mxu0 %v1790_v1  ;;  %v1825_v10 = vld [vmem:[%s1781_s24 + $0xe0] sm:$0xff]  ;;  %1345 = vmatpush3.msra.mxu1 %v1790_v1  ;;  %v368_v36 = vadd.f32 %v1797_v4, %v1795_v3  ;;  %327 = vst.msk [vmem:[#allocation2 + $0x30] sm:$0xff] %vm320_vm1, %v1730_v37 }
  0x12   : > { %453 = vrot.lane.b32.xlu1 %v1811_v7, %s1722_s5  ;;  %1311 = vmatprep.subr.mxu0 %v1793_v2  ;;  %v1820_v9 = vld [vmem:[%s1781_s24 + $0x68] sm:$0xff]  ;;  %v1829_v11 = vld [vmem:[%s1781_s24 + $0x60] sm:$0xff]  ;;  %v1834_v12 = vld [vmem:[%s1781_s24 + $0xd8] sm:$0xff]  ;;  %328 = vst.msk [vmem:[#allocation2 + $0x38] sm:$0xff] %vm320_vm1, %v1730_v37  ;;  %s2222_s20 = scalar_lea.vmem %s2268_s3, %s1624_s13 }
  0x13   : > { %1659 = vrot.lane.b32.xlu0 %v1809_v6, %s1722_s5  ;;  %1312 = vmatpush3.msra.mxu0 %v1804_v5  ;;  %v1840_v13 = vld [vmem:[%s1781_s24 + $0x58] sm:$0xff]  ;;  %v1845_v14 = vld [vmem:[%s1781_s24 + $0xd0] sm:$0xff]  ;;  %v1854_v16 = vld [vmem:[%s1781_s24 + $0xc8] sm:$0xff]  ;;  %329 = vst.msk [vmem:[#allocation2 + $0x40] sm:$0xff] %vm320_vm1, %v1730_v37 }
  0x14   : > { %1313 = vmatprep.subr.mxu0 %v1815_v8  ;;  %439 = vmatprep.mubr.f32.mxu0 %v1797_v4  ;;  %v1849_v15 = vld [vmem:[%s1781_s24 + $0x50] sm:$0xff]  ;;  %v1860_v17 = vld [vmem:[%s1781_s24 + $0x48] sm:$0xff]  ;;  %v1865_v18 = vld [vmem:[%s1781_s24 + $0xc0] sm:$0xff]  ;;  %331 = vst.msk [vmem:[#allocation3] sm:$0xff] %vm330_vm0, %v1730_v37 }
  0x15   : > { %1314 = vmatpush3.msra.mxu0 %v1820_v9  ;;  %1346 = vmatprep.subr.mxu1 %v1793_v2  ;;  %v1869_v19 = vld [vmem:[%s1781_s24 + $0x40] sm:$0xff]  ;;  %v1874_v20 = vld [vmem:[%s1781_s24 + $0xb8] sm:$0xff]  ;;  %v1885_v22 = vld [vmem:[%s1781_s24 + $0xb0] sm:$0xff] }
  0x16   : > { %537 = vrot.lane.b32.xlu1 %v1811_v7, %s1723_s6  ;;  %1315 = vmatprep.subr.mxu0 %v1825_v10  ;;  %v1880_v21 = vld [vmem:[%s1781_s24 + $0x38] sm:$0xff]  ;;  %v1889_v23 = vld [vmem:[%s1781_s24 + $0x30] sm:$0xff]  ;;  %v1894_v24 = vld [vmem:[%s1781_s24 + $0xa8] sm:$0xff] }
  0x17   : > { %1664 = vrot.lane.b32.xlu0 %v1809_v6, %s1723_s6  ;;  %1316 = vmatpush3.msra.mxu0 %v1829_v11  ;;  %v1900_v25 = vld [vmem:[%s1781_s24 + $0x28] sm:$0xff]  ;;  %v1905_v26 = vld [vmem:[%s1781_s24 + $0xa0] sm:$0xff]  ;;  %v1914_v28 = vld [vmem:[%s1781_s24 + $0x98] sm:$0xff] }
  0x18   : > { %1317 = vmatprep.subr.mxu0 %v1834_v12  ;;  %1347 = vmatpush3.msra.mxu1 %v1804_v5  ;;  %v1909_v27 = vld [vmem:[%s1781_s24 + $0x20] sm:$0xff]  ;;  %v1920_v29 = vld [vmem:[%s1781_s24 + $0x18] sm:$0xff]  ;;  %v1925_v30 = vld [vmem:[%s1781_s24 + $0x90] sm:$0xff] }
  0x19   : > { %1318 = vmatpush3.msra.mxu0 %v1840_v13  ;;  %1348 = vmatprep.subr.mxu1 %v1815_v8  ;;  %v1929_v31 = vld [vmem:[%s1781_s24 + $0x10] sm:$0xff]  ;;  %v1934_v32 = vld [vmem:[%s1781_s24 + $0x88] sm:$0xff]  ;;  %v1944_v34 = vld [vmem:[%s1781_s24 + $0x80] sm:$0xff] }
  0x1a   : > { %1674 = vrot.lane.b32.xlu1 %v1809_v6, %s1724_s7  ;;  %1319 = vmatprep.subr.mxu0 %v1845_v14  ;;  %v1939_v33 = vld [vmem:[%s1781_s24 + $0x8] sm:$0xff]  ;;  %v1949_v35 = vld [vmem:[%s1781_s24] sm:$0xff]  ;;  %s315_s24 = scalar_lea.vmem %s2269_s4, %s1301_s21 }
  0x1b   : > { %1669 = vrot.lane.b32.xlu0 %v1809_v6, %s1725_s8  ;;  %1320 = vmatpush3.msra.mxu0 %v1849_v15 }
  0x1c   : > { %1321 = vmatprep.subr.mxu0 %v1854_v16  ;;  %1349 = vmatpush3.msra.mxu1 %v1820_v9 }
  0x1d   : > { %1322 = vmatpush3.msra.mxu0 %v1860_v17  ;;  %1350 = vmatprep.subr.mxu1 %v1825_v10 }
  0x1e   : > { %707 = vrot.lane.b32.xlu1 %v1811_v7, %s1724_s7  ;;  %1323 = vmatprep.subr.mxu0 %v1865_v18 }
  0x1f   : > { %622 = vrot.lane.b32.xlu0 %v1811_v7, %s1725_s8  ;;  %1324 = vmatpush3.msra.mxu0 %v1869_v19 }
  0x20   : > { %1325 = vmatprep.subr.mxu0 %v1874_v20  ;;  %1351 = vmatpush3.msra.mxu1 %v1829_v11 }
  0x21   : > { %1326 = vmatpush3.msra.mxu0 %v1880_v21  ;;  %1352 = vmatprep.subr.mxu1 %v1834_v12 }
  0x22   : > { %1684 = vrot.lane.b32.xlu1 %v1809_v6, %s1726_s9  ;;  %1327 = vmatprep.subr.mxu0 %v1885_v22 }
  0x23   : > { %1679 = vrot.lane.b32.xlu0 %v1809_v6, %s1727_s10  ;;  %1328 = vmatpush3.msra.mxu0 %v1889_v23 }
  0x24   : > { %1329 = vmatprep.subr.mxu0 %v1894_v24  ;;  %1353 = vmatpush3.msra.mxu1 %v1840_v13 }
  0x25   : > { %1330 = vmatpush3.msra.mxu0 %v1900_v25  ;;  %1354 = vmatprep.subr.mxu1 %v1845_v14 }
  0x26   : > { %877 = vrot.lane.b32.xlu1 %v1811_v7, %s1726_s9  ;;  %1331 = vmatprep.subr.mxu0 %v1905_v26 }
  0x27   : > { %792 = vrot.lane.b32.xlu0 %v1811_v7, %s1727_s10  ;;  %1332 = vmatpush3.msra.mxu0 %v1909_v27 }
  0x28   : > { %1333 = vmatprep.subr.mxu0 %v1914_v28  ;;  %1355 = vmatpush3.msra.mxu1 %v1849_v15 }
  0x29   : > { %1334 = vmatpush3.msra.mxu0 %v1920_v29  ;;  %1356 = vmatprep.subr.mxu1 %v1854_v16 }
  0x2a   : > { %1335 = vmatprep.subr.mxu0 %v1925_v30  ;;  %1694 = vrot.lane.b32.xlu1 %v1809_v6, %s1728_s11 }
  0x2b   : > { %1336 = vmatpush3.msra.mxu0 %v1929_v31  ;;  %1689 = vrot.lane.b32.xlu0 %v1809_v6, %s1729_s12 }
  0x2c   : > { %1337 = vmatprep.subr.mxu0 %v1934_v32  ;;  %1357 = vmatpush3.msra.mxu1 %v1860_v17 }
  0x2d   : > { %1338 = vmatpush3.msra.mxu0 %v1939_v33  ;;  %1358 = vmatprep.subr.mxu1 %v1865_v18 }
  0x2e   : > { %1339 = vmatprep.subr.mxu0 %v1944_v34  ;;  %1047 = vrot.lane.b32.xlu1 %v1811_v7, %s1728_s11 }
  0x2f   : > { %1340 = vmatpush3.msra.mxu0 %v1949_v35  ;;  %962 = vrot.lane.b32.xlu0 %v1811_v7, %s1729_s12 }
  0x30   : > { %440 = vmatmul.mubr.f32.vlgmr.msra.gmra.mxu0 %v1795_v3  ;;  %1379 = vmatprep.subr.mxu0 %v1787_v0 }
  0x31   : > { %1380 = vmatpush3.msra.mxu0 %v1790_v1  ;;  %1359 = vmatpush3.msra.mxu1 %v1869_v19 }
  0x32   : > { %1381 = vmatprep.subr.mxu0 %v1793_v2  ;;  %1360 = vmatprep.subr.mxu1 %v1874_v20 }
  0x33   : > { %1382 = vmatpush3.msra.mxu0 %v1804_v5  ;;  %1361 = vmatpush3.msra.mxu1 %v1880_v21 }
  0x34   : > { %1383 = vmatprep.subr.mxu0 %v1815_v8  ;;  %1362 = vmatprep.subr.mxu1 %v1885_v22 }
  0x35   : > { %1384 = vmatpush3.msra.mxu0 %v1820_v9  ;;  %1363 = vmatpush3.msra.mxu1 %v1889_v23 }
  0x36   : > { %1385 = vmatprep.subr.mxu0 %v1825_v10  ;;  %1364 = vmatprep.subr.mxu1 %v1894_v24 }
  0x37   : > { %1386 = vmatpush3.msra.mxu0 %v1829_v11  ;;  %1365 = vmatpush3.msra.mxu1 %v1900_v25 }
  0x38   : > { %1387 = vmatprep.subr.mxu0 %v1834_v12  ;;  %1366 = vmatprep.subr.mxu1 %v1905_v26 }
  0x39   : > { %1388 = vmatpush3.msra.mxu0 %v1840_v13  ;;  %1367 = vmatpush3.msra.mxu1 %v1909_v27 }
  0x3a   : > { %1389 = vmatprep.subr.mxu0 %v1845_v14  ;;  %1368 = vmatprep.subr.mxu1 %v1914_v28 }
  0x3b   : > { %1390 = vmatpush3.msra.mxu0 %v1849_v15  ;;  %1369 = vmatpush3.msra.mxu1 %v1920_v29 }
  0x3c   : > { %1391 = vmatprep.subr.mxu0 %v1854_v16  ;;  %1370 = vmatprep.subr.mxu1 %v1925_v30 }
  0x3d   : > { %1392 = vmatpush3.msra.mxu0 %v1860_v17  ;;  %1371 = vmatpush3.msra.mxu1 %v1929_v31 }
  0x3e   : > { %1393 = vmatprep.subr.mxu0 %v1865_v18  ;;  %1372 = vmatprep.subr.mxu1 %v1934_v32 }
  0x3f   : > { %1394 = vmatpush3.msra.mxu0 %v1869_v19  ;;  %1373 = vmatpush3.msra.mxu1 %v1939_v33 }
  0x40   : > { %1395 = vmatprep.subr.mxu0 %v1874_v20  ;;  %1374 = vmatprep.subr.mxu1 %v1944_v34 }
  0x41   : > { %1396 = vmatpush3.msra.mxu0 %v1880_v21  ;;  %1375 = vmatpush3.msra.mxu1 %v1949_v35 }
  0x42   : > { %1397 = vmatprep.subr.mxu0 %v1885_v22  ;;  %1414 = vmatprep.subr.mxu1 %v1787_v0 }
  0x43   : > { %1398 = vmatpush3.msra.mxu0 %v1889_v23 }
  0x44   : > { %1399 = vmatprep.subr.mxu0 %v1894_v24 }
  0x45   : > { %1400 = vmatpush3.msra.mxu0 %v1900_v25 }
  0x46   : > { %1401 = vmatprep.subr.mxu0 %v1905_v26 }
  0x47   : > { %1402 = vmatpush3.msra.mxu0 %v1909_v27 }
  0x48   : > { %1403 = vmatprep.subr.mxu0 %v1914_v28 }
  0x49   : > { %1404 = vmatpush3.msra.mxu0 %v1920_v29 }
  0x4a   : > { %1405 = vmatprep.subr.mxu0 %v1925_v30 }
  0x4b   : > { %1406 = vmatpush3.msra.mxu0 %v1929_v31 }
  0x4c   : > { %1407 = vmatprep.subr.mxu0 %v1934_v32 }
  0x4d   : > { %1408 = vmatpush3.msra.mxu0 %v1939_v33 }
  0x4e   : > { %1409 = vmatprep.subr.mxu0 %v1944_v34  ;;  %369 = vadd.xlane.f32.xlu0 %v368_v36 }
  0x4f   : > { %1410 = vmatpush3.msra.mxu0 %v1949_v35 }
  0x50   : > { %1449 = vmatprep.subr.mxu0 %v1787_v0 }
  0x84   : > { %v454_v38 = vpop.permute.xlu1 %453 }
  0x85   : > { %v1660_v39 = vpop.permute.xlu0 %1659 }
  0x86   : > { %v1662_v40 = vunpack.i.h.bf16 %v1660_v39  ;;  %v1661_v41 = vunpack.i.l.bf16 %v1660_v39 }
  0x88   : > { %v460_v42 = vsel %vm330_vm0, %v1661_v41, %v1662_v40  ;;  %v459_v43 = vsel %vm330_vm0, %v454_v38, %v1661_v41  ;;  %v538_v45 = vpop.permute.xlu1 %537 }
  0x89   : > { %v1665_v44 = vpop.permute.xlu0 %1664  ;;  %527 = vmatprep.mubr.f32.mxu1 %v460_v42 }
  0x8a   : > { %v1667_v46 = vunpack.i.h.bf16 %v1665_v44  ;;  %v1666_v47 = vunpack.i.l.bf16 %v1665_v44  ;;  %528 = vmatmul.mubr.f32.vlgmr.msra.gmra.mxu1 %v459_v43 }
  0x8b   : > { %1415 = vmatpush3.msra.mxu1 %v1790_v1 }
  0x8c   : > { %1416 = vmatprep.subr.mxu1 %v1793_v2  ;;  %v544_v48 = vsel %vm543_vm2, %v538_v45, %v1666_v47  ;;  %v545_v49 = vsel %vm543_vm2, %v1666_v47, %v1667_v46  ;;  %v1675_v53 = vpop.permute.xlu1 %1674  ;;  %v621_v45 = vld [vmem:[#allocation2 + $0x18] sm:$0xff] }
  0x8d   : > { %1417 = vmatpush3.msra.mxu1 %v1804_v5  ;;  %612 = vmatprep.mubr.f32.mxu0 %v545_v49  ;;  %v1670_v50 = vpop.permute.xlu0 %1669  ;;  %v1677_v55 = vunpack.i.h.bf16 %v1675_v53  ;;  %v1676_v56 = vunpack.i.l.bf16 %v1675_v53 }
  0x8e   : > { %1418 = vmatprep.subr.mxu1 %v1815_v8  ;;  %613 = vmatmul.mubr.f32.vlgmr.msra.gmra.mxu0 %v544_v48  ;;  %v1672_v51 = vunpack.i.h.bf16 %v1670_v50  ;;  %v1671_v52 = vunpack.i.l.bf16 %v1670_v50  ;;  %v706_v50 = vld [vmem:[#allocation2 + $0x20] sm:$0xff] }
  0x8f   : > { %1419 = vmatpush3.msra.mxu1 %v1820_v9  ;;  %1450 = vmatpush3.msra.mxu0 %v1790_v1  ;;  %v715_v60 = vsel %vm713_vm4, %v1676_v56, %v1677_v55 }
  0x90   : > { %1420 = vmatprep.subr.mxu1 %v1825_v10  ;;  %1451 = vmatprep.subr.mxu0 %v1793_v2  ;;  %v630_v57 = vsel %vm628_vm3, %v1671_v52, %v1672_v51  ;;  %v708_v59 = vpop.permute.xlu1 %707 }
  0x91   : > { %1421 = vmatpush3.msra.mxu1 %v1829_v11  ;;  %1452 = vmatpush3.msra.mxu0 %v1804_v5  ;;  %v623_v54 = vpop.permute.xlu0 %622  ;;  %v714_v61 = vsel %vm713_vm4, %v708_v59, %v1676_v56 }
  0x92   : > { %1422 = vmatprep.subr.mxu1 %v1834_v12  ;;  %1453 = vmatprep.subr.mxu0 %v1815_v8  ;;  %v629_v58 = vsel %vm628_vm3, %v623_v54, %v1671_v52 }
  0x93   : > { %1423 = vmatpush3.msra.mxu1 %v1840_v13  ;;  %1454 = vmatpush3.msra.mxu0 %v1820_v9 }
  0x94   : > { %1424 = vmatprep.subr.mxu1 %v1845_v14  ;;  %1455 = vmatprep.subr.mxu0 %v1825_v10  ;;  %v1685_v4 = vpop.permute.xlu1 %1684 }
  0x95   : > { %1425 = vmatpush3.msra.mxu1 %v1849_v15  ;;  %1456 = vmatpush3.msra.mxu0 %v1829_v11  ;;  %v1680_v62 = vpop.permute.xlu0 %1679  ;;  %v1687_v7 = vunpack.i.h.bf16 %v1685_v4  ;;  %v1686_v36 = vunpack.i.l.bf16 %v1685_v4 }
  0x96   : > { %1426 = vmatprep.subr.mxu1 %v1854_v16  ;;  %1457 = vmatprep.subr.mxu0 %v1834_v12  ;;  %v1682_v63 = vunpack.i.h.bf16 %v1680_v62  ;;  %v1681_v3 = vunpack.i.l.bf16 %v1680_v62  ;;  %v876_v62 = vld [vmem:[#allocation2 + $0x30] sm:$0xff] }
  0x97   : > { %1427 = vmatpush3.msra.mxu1 %v1860_v17  ;;  %1458 = vmatpush3.msra.mxu0 %v1840_v13  ;;  %v885_v40 = vsel %vm883_vm6, %v1686_v36, %v1687_v7 }
  0x98   : > { %1428 = vmatprep.subr.mxu1 %v1865_v18  ;;  %1459 = vmatprep.subr.mxu0 %v1845_v14  ;;  %v800_v37 = vsel %vm798_vm5, %v1681_v3, %v1682_v63  ;;  %v878_v39 = vpop.permute.xlu1 %877 }
  0x99   : > { %1429 = vmatpush3.msra.mxu1 %v1869_v19  ;;  %1460 = vmatpush3.msra.mxu0 %v1849_v15  ;;  %v793_v6 = vpop.permute.xlu0 %792  ;;  %v884_v41 = vsel %vm883_vm6, %v878_v39, %v1686_v36 }
  0x9a   : > { %1430 = vmatprep.subr.mxu1 %v1874_v20  ;;  %1461 = vmatprep.subr.mxu0 %v1854_v16  ;;  %v799_v38 = vsel %vm798_vm5, %v793_v6, %v1681_v3 }
  0x9b   : > { %1431 = vmatpush3.msra.mxu1 %v1880_v21  ;;  %1462 = vmatpush3.msra.mxu0 %v1860_v17 }
  0x9c   : > { %1432 = vmatprep.subr.mxu1 %v1885_v22  ;;  %1463 = vmatprep.subr.mxu0 %v1865_v18 }
  0x9d   : > { %1433 = vmatpush3.msra.mxu1 %v1889_v23  ;;  %1464 = vmatpush3.msra.mxu0 %v1869_v19 }
  0x9e   : > { %1434 = vmatprep.subr.mxu1 %v1894_v24  ;;  %1465 = vmatprep.subr.mxu0 %v1874_v20 }
  0x9f   : > { %1435 = vmatpush3.msra.mxu1 %v1900_v25  ;;  %1466 = vmatpush3.msra.mxu0 %v1880_v21 }
  0xa0   : > { %1436 = vmatprep.subr.mxu1 %v1905_v26  ;;  %1467 = vmatprep.subr.mxu0 %v1885_v22 }
  0xa1   : > { %1437 = vmatpush3.msra.mxu1 %v1909_v27  ;;  %1468 = vmatpush3.msra.mxu0 %v1889_v23 }
  0xa2   : > { %1438 = vmatprep.subr.mxu1 %v1914_v28  ;;  %1469 = vmatprep.subr.mxu0 %v1894_v24 }
  0xa3   : > { %1439 = vmatpush3.msra.mxu1 %v1920_v29  ;;  %1470 = vmatpush3.msra.mxu0 %v1900_v25 }
  0xa4   : > { %1440 = vmatprep.subr.mxu1 %v1925_v30  ;;  %1471 = vmatprep.subr.mxu0 %v1905_v26 }
  0xa5   : > { %1441 = vmatpush3.msra.mxu1 %v1929_v31  ;;  %1472 = vmatpush3.msra.mxu0 %v1909_v27 }
  0xa6   : > { %1442 = vmatprep.subr.mxu1 %v1934_v32  ;;  %1473 = vmatprep.subr.mxu0 %v1914_v28 }
  0xa7   : > { %1443 = vmatpush3.msra.mxu1 %v1939_v33  ;;  %1474 = vmatpush3.msra.mxu0 %v1920_v29 }
  0xa8   : > { %1444 = vmatprep.subr.mxu1 %v1944_v34  ;;  %1475 = vmatprep.subr.mxu0 %v1925_v30 }
  0xa9   : > { %1445 = vmatpush3.msra.mxu1 %v1949_v35  ;;  %1476 = vmatpush3.msra.mxu0 %v1929_v31 }
  0xaa   : > { %697 = vmatprep.mubr.f32.mxu1 %v630_v57  ;;  %1477 = vmatprep.subr.mxu0 %v1934_v32  ;;  %v791_v57 = vld [vmem:[#allocation2 + $0x28] sm:$0xff] }
  0xab   : > { %1484 = vmatprep.subr.mxu1 %v1787_v0  ;;  %698 = vmatmul.mubr.f32.vlgmr.msra.gmra.mxu1 %v629_v58 }
  0xac   : > { %1478 = vmatpush3.msra.mxu0 %v1939_v33  ;;  %1485 = vmatpush3.msra.mxu1 %v1790_v1 }
  0xad   : > { %1479 = vmatprep.subr.mxu0 %v1944_v34  ;;  %1486 = vmatprep.subr.mxu1 %v1793_v2 }
  0xae   : > { %1480 = vmatpush3.msra.mxu0 %v1949_v35  ;;  %782 = vmatprep.mubr.f32.mxu0 %v715_v60 }
  0xaf   : > { %1487 = vmatpush3.msra.mxu1 %v1804_v5  ;;  %783 = vmatmul.mubr.f32.vlgmr.msra.gmra.mxu0 %v714_v61 }
  0xb0   : > { %1488 = vmatprep.subr.mxu1 %v1815_v8  ;;  %1519 = vmatprep.subr.mxu0 %v1787_v0 }
  0xb1   : > { %1489 = vmatpush3.msra.mxu1 %v1820_v9  ;;  %1520 = vmatpush3.msra.mxu0 %v1790_v1 }
  0xb2   : > { %1490 = vmatprep.subr.mxu1 %v1825_v10  ;;  %1521 = vmatprep.subr.mxu0 %v1793_v2 }
  0xb3   : > { %1491 = vmatpush3.msra.mxu1 %v1829_v11  ;;  %1522 = vmatpush3.msra.mxu0 %v1804_v5 }
  0xb4   : > { %1492 = vmatprep.subr.mxu1 %v1834_v12  ;;  %1523 = vmatprep.subr.mxu0 %v1815_v8 }
  0xb5   : > { %1493 = vmatpush3.msra.mxu1 %v1840_v13  ;;  %1524 = vmatpush3.msra.mxu0 %v1820_v9 }
  0xb6   : > { %1494 = vmatprep.subr.mxu1 %v1845_v14  ;;  %1525 = vmatprep.subr.mxu0 %v1825_v10 }
  0xb7   : > { %1495 = vmatpush3.msra.mxu1 %v1849_v15  ;;  %1526 = vmatpush3.msra.mxu0 %v1829_v11 }
  0xb8   : > { %1496 = vmatprep.subr.mxu1 %v1854_v16  ;;  %1527 = vmatprep.subr.mxu0 %v1834_v12 }
  0xb9   : > { %1497 = vmatpush3.msra.mxu1 %v1860_v17  ;;  %1528 = vmatpush3.msra.mxu0 %v1840_v13 }
  0xba   : > { %1498 = vmatprep.subr.mxu1 %v1865_v18  ;;  %1529 = vmatprep.subr.mxu0 %v1845_v14 }
  0xbb   : > { %1499 = vmatpush3.msra.mxu1 %v1869_v19  ;;  %1530 = vmatpush3.msra.mxu0 %v1849_v15 }
  0xbc   : > { %1500 = vmatprep.subr.mxu1 %v1874_v20  ;;  %1531 = vmatprep.subr.mxu0 %v1854_v16 }
  0xbd   : > { %1501 = vmatpush3.msra.mxu1 %v1880_v21  ;;  %1532 = vmatpush3.msra.mxu0 %v1860_v17 }
  0xbe   : > { %1502 = vmatprep.subr.mxu1 %v1885_v22  ;;  %1533 = vmatprep.subr.mxu0 %v1865_v18 }
  0xbf   : > { %1503 = vmatpush3.msra.mxu1 %v1889_v23  ;;  %1534 = vmatpush3.msra.mxu0 %v1869_v19 }
  0xc0   : > { %1504 = vmatprep.subr.mxu1 %v1894_v24  ;;  %1535 = vmatprep.subr.mxu0 %v1874_v20 }
  0xc1   : > { %1505 = vmatpush3.msra.mxu1 %v1900_v25  ;;  %1536 = vmatpush3.msra.mxu0 %v1880_v21 }
  0xc2   : > { %1506 = vmatprep.subr.mxu1 %v1905_v26  ;;  %1537 = vmatprep.subr.mxu0 %v1885_v22 }
  0xc3   : > { %1507 = vmatpush3.msra.mxu1 %v1909_v27  ;;  %1538 = vmatpush3.msra.mxu0 %v1889_v23 }
  0xc4   : > { %1508 = vmatprep.subr.mxu1 %v1914_v28  ;;  %1539 = vmatprep.subr.mxu0 %v1894_v24 }
  0xc5   : > { %1509 = vmatpush3.msra.mxu1 %v1920_v29  ;;  %1540 = vmatpush3.msra.mxu0 %v1900_v25 }
  0xc6   : > { %1510 = vmatprep.subr.mxu1 %v1925_v30  ;;  %1541 = vmatprep.subr.mxu0 %v1905_v26 }
  0xc7   : > { %1511 = vmatpush3.msra.mxu1 %v1929_v31  ;;  %1542 = vmatpush3.msra.mxu0 %v1909_v27 }
  0xc8   : > { %1512 = vmatprep.subr.mxu1 %v1934_v32  ;;  %1543 = vmatprep.subr.mxu0 %v1914_v28 }
  0xc9   : > { %1513 = vmatpush3.msra.mxu1 %v1939_v33  ;;  %1544 = vmatpush3.msra.mxu0 %v1920_v29 }
  0xca   : > { %1514 = vmatprep.subr.mxu1 %v1944_v34  ;;  %1545 = vmatprep.subr.mxu0 %v1925_v30 }
  0xcb   : > { %1515 = vmatpush3.msra.mxu1 %v1949_v35  ;;  %1546 = vmatpush3.msra.mxu0 %v1929_v31 }
  0xcc   : > { %867 = vmatprep.mubr.f32.mxu1 %v800_v37  ;;  %1547 = vmatprep.subr.mxu0 %v1934_v32  ;;  %v961_v37 = vld [vmem:[#allocation2 + $0x38] sm:$0xff] }
  0xcd   : > { %1554 = vmatprep.subr.mxu1 %v1787_v0  ;;  %868 = vmatmul.mubr.f32.vlgmr.msra.gmra.mxu1 %v799_v38 }
  0xce   : > { %1555 = vmatpush3.msra.mxu1 %v1790_v1  ;;  %1548 = vmatpush3.msra.mxu0 %v1939_v33 }
  0xcf   : > { %1549 = vmatprep.subr.mxu0 %v1944_v34  ;;  %1556 = vmatprep.subr.mxu1 %v1793_v2 }
  0xd0   : > { %1550 = vmatpush3.msra.mxu0 %v1949_v35  ;;  %952 = vmatprep.mubr.f32.mxu0 %v885_v40 }
  0xd1   : > { %1557 = vmatpush3.msra.mxu1 %v1804_v5  ;;  %953 = vmatmul.mubr.f32.vlgmr.msra.gmra.mxu0 %v884_v41 }
  0xd2   : > { %1558 = vmatprep.subr.mxu1 %v1815_v8  ;;  %1589 = vmatprep.subr.mxu0 %v1787_v0  ;;  %v1690_v0 = vpop.permute.xlu0 %1689 }
  0xd3   : > { %1559 = vmatpush3.msra.mxu1 %v1820_v9  ;;  %1590 = vmatpush3.msra.mxu0 %v1790_v1  ;;  %v1692_v1 = vunpack.i.h.bf16 %v1690_v0 }
  0xd4   : > { %1560 = vmatprep.subr.mxu1 %v1825_v10  ;;  %1591 = vmatprep.subr.mxu0 %v1793_v2  ;;  %v1691_v2 = vunpack.i.l.bf16 %v1690_v0  ;;  %v1046_v0 = vld [vmem:[#allocation2 + $0x40] sm:$0xff] }
  0xd5   : > { %1561 = vmatpush3.msra.mxu1 %v1829_v11  ;;  %1592 = vmatpush3.msra.mxu0 %v1804_v5  ;;  %v1695_v5 = vpop.permute.xlu1 %1694 }
  0xd6   : > { %1562 = vmatprep.subr.mxu1 %v1834_v12  ;;  %1593 = vmatprep.subr.mxu0 %v1815_v8  ;;  %v1697_v8 = vunpack.i.h.bf16 %v1695_v5 }
  0xd7   : > { %1563 = vmatpush3.msra.mxu1 %v1840_v13  ;;  %1594 = vmatpush3.msra.mxu0 %v1820_v9  ;;  %v1696_v9 = vunpack.i.l.bf16 %v1695_v5 }
  0xd8   : > { %1564 = vmatprep.subr.mxu1 %v1845_v14  ;;  %1595 = vmatprep.subr.mxu0 %v1825_v10  ;;  %v963_v10 = vpop.permute.xlu0 %962 }
  0xd9   : > { %1565 = vmatpush3.msra.mxu1 %v1849_v15  ;;  %1596 = vmatpush3.msra.mxu0 %v1829_v11  ;;  %v970_v11 = vsel %vm968_vm7, %v1691_v2, %v1692_v1 }
  0xda   : > { %1566 = vmatprep.subr.mxu1 %v1854_v16  ;;  %1597 = vmatprep.subr.mxu0 %v1834_v12  ;;  %v969_v12 = vsel %vm968_vm7, %v963_v10, %v1691_v2 }
  0xdb   : > { %1567 = vmatpush3.msra.mxu1 %v1860_v17  ;;  %1598 = vmatpush3.msra.mxu0 %v1840_v13  ;;  %v1055_v13 = vsel %vm1053_vm8, %v1696_v9, %v1697_v8 }
  0xdc   : > { %1568 = vmatprep.subr.mxu1 %v1865_v18  ;;  %1599 = vmatprep.subr.mxu0 %v1845_v14  ;;  %v1048_v14 = vpop.permute.xlu1 %1047 }
  0xdd   : > { %1569 = vmatpush3.msra.mxu1 %v1869_v19  ;;  %1600 = vmatpush3.msra.mxu0 %v1849_v15 }
  0xde   : > { %1570 = vmatprep.subr.mxu1 %v1874_v20  ;;  %1601 = vmatprep.subr.mxu0 %v1854_v16  ;;  %v1054_v16 = vsel %vm1053_vm8, %v1048_v14, %v1696_v9 }
  0xdf   : > { %1571 = vmatpush3.msra.mxu1 %v1880_v21  ;;  %1602 = vmatpush3.msra.mxu0 %v1860_v17  ;;  %v374_v17 = vld [vmem:[#allocation2] sm:$0xff] }
  0xe0   : > { %1572 = vmatprep.subr.mxu1 %v1885_v22  ;;  %1603 = vmatprep.subr.mxu0 %v1865_v18 }
  0xe1   : > { %1573 = vmatpush3.msra.mxu1 %v1889_v23  ;;  %1604 = vmatpush3.msra.mxu0 %v1869_v19 }
  0xe2   : > { %1574 = vmatprep.subr.mxu1 %v1894_v24  ;;  %1605 = vmatprep.subr.mxu0 %v1874_v20 }
  0xe3   : > { %1575 = vmatpush3.msra.mxu1 %v1900_v25  ;;  %1606 = vmatpush3.msra.mxu0 %v1880_v21 }
  0xe4   : > { %1576 = vmatprep.subr.mxu1 %v1905_v26  ;;  %1607 = vmatprep.subr.mxu0 %v1885_v22  ;;  %v367_v22 = vld [vmem:[#allocation3] sm:$0xff] }
  0xe5   : > { %1577 = vmatpush3.msra.mxu1 %v1909_v27  ;;  %1608 = vmatpush3.msra.mxu0 %v1889_v23  ;;  %v370_v23 = vpop.xlane.xlu0 %369 }
  0xe6   : > { %1578 = vmatprep.subr.mxu1 %v1914_v28  ;;  %1609 = vmatprep.subr.mxu0 %v1894_v24  ;;  %v371_v24 = vadd.f32 %v370_v23, %v367_v22 }
  0xe7   : > { %1579 = vmatpush3.msra.mxu1 %v1920_v29  ;;  %1610 = vmatpush3.msra.mxu0 %v1900_v25 }
  0xe8   : > { %1580 = vmatprep.subr.mxu1 %v1925_v30  ;;  %1611 = vmatprep.subr.mxu0 %v1905_v26  ;;  %373 = vst.msk [vmem:[#allocation3] sm:$0xff] %vm330_vm0, %v371_v24 }
  0xe9   : > { %1581 = vmatpush3.msra.mxu1 %v1929_v31  ;;  %1612 = vmatpush3.msra.mxu0 %v1909_v27  ;;  %v449_v27 = vld [vmem:[#allocation2 + $0x8] sm:$0xff] }
  0xea   : > { %1582 = vmatprep.subr.mxu1 %v1934_v32  ;;  %1613 = vmatprep.subr.mxu0 %v1914_v28 }
  0xeb   : > { %1583 = vmatpush3.msra.mxu1 %v1939_v33  ;;  %1614 = vmatpush3.msra.mxu0 %v1920_v29 }
  0xec   : > { %1584 = vmatprep.subr.mxu1 %v1944_v34  ;;  %1615 = vmatprep.subr.mxu0 %v1925_v30 }
  0xed   : > { %1585 = vmatpush3.msra.mxu1 %v1949_v35  ;;  %1037 = vmatprep.mubr.f32.mxu1 %v970_v11 }
  0xee   : > { %1616 = vmatpush3.msra.mxu0 %v1929_v31  ;;  %1038 = vmatmul.mubr.f32.vlgmr.msra.gmra.mxu1 %v969_v12 }
  0xef   : > { %1617 = vmatprep.subr.mxu0 %v1934_v32  ;;  %1122 = vmatprep.mubr.f32.mxu0 %v1055_v13  ;;  %v1151_v25 = vld [vmem:[#allocation3] sm:$0xff]  ;;  %v536_v32 = vld [vmem:[#allocation2 + $0x10] sm:$0xff] }
  0xf0   : > { %1618 = vmatpush3.msra.mxu0 %v1939_v33  ;;  %v1341_v15 = vpop.f32.mrf.mxu0  ;;  %1152 = vst.msk [vmem:[%s315_s24] sm:$0xff] %vm330_vm0, %v1151_v25 }
  0xf1   : > { %1619 = vmatprep.subr.mxu0 %v1944_v34 }
  0xf2   : > { %1620 = vmatpush3.msra.mxu0 %v1949_v35  ;;  %v1342_v18 = vpop.f32.mrf.mxu0 }
  0xf3   : > { %1123 = vmatmul.mubr.f32.vlgmr.msra.gmra.mxu0 %v1054_v16  ;;  %v1343_v19 = vadd.f32 %v1342_v18, %v1341_v15 }
  0xf5   : > { %v445_v20 = vadd.f32 %v1343_v19, %v374_v17 }
  0xf7   : > { %447 = vst.msk [vmem:[#allocation2] sm:$0xff] %vm320_vm1, %v445_v20 }
  0xfe   : > { %v1133_v21 = vld [vmem:[#allocation2] sm:$0xff] }
  0xff   : > { %1142 = vst.msk [vmem:[%s2222_s20] sm:$0xff] %vm320_vm1, %v1133_v21 }
 0x14a   : > { %v1376_v26 = vpop.f32.mrf.mxu1 }
 0x14c   : > { %v1377_v28 = vpop.f32.mrf.mxu1 }
 0x14d   : > { %v1378_v29 = vadd.f32 %v1377_v28, %v1376_v26 }
 0x14e   : > { %v1411_v30 = vpop.f32.mrf.mxu0 }
 0x14f   : > { %v533_v31 = vadd.f32 %v1378_v29, %v449_v27 }
 0x150   : > { %v1412_v33 = vpop.f32.mrf.mxu0 }
 0x151   : > { %534 = vst.msk [vmem:[#allocation2 + $0x8] sm:$0xff] %vm320_vm1, %v533_v31  ;;  %v1413_v34 = vadd.f32 %v1412_v33, %v1411_v30 }
 0x153   : > { %v618_v35 = vadd.f32 %v1413_v34, %v536_v32 }
 0x155   : > { %619 = vst.msk [vmem:[#allocation2 + $0x10] sm:$0xff] %vm320_vm1, %v618_v35 }
 0x158   : > { %v1134_v42 = vld [vmem:[#allocation2 + $0x8] sm:$0xff] }
 0x159   : > { %1143 = vst.msk [vmem:[%s2222_s20 + $0x8] sm:$0xff] %vm320_vm1, %v1134_v42 }
 0x15c   : > { %v1135_v43 = vld [vmem:[#allocation2 + $0x10] sm:$0xff] }
 0x15d   : > { %1144 = vst.msk [vmem:[%s2222_s20 + $0x10] sm:$0xff] %vm320_vm1, %v1135_v43 }
 0x16b   : > { %v1446_v44 = vpop.f32.mrf.mxu1 }
 0x16d   : > { %v1447_v46 = vpop.f32.mrf.mxu1 }
 0x16e   : > { %v1448_v47 = vadd.f32 %v1447_v46, %v1446_v44 }
 0x16f   : > { %v1481_v48 = vpop.f32.mrf.mxu0 }
 0x170   : > { %v703_v49 = vadd.f32 %v1448_v47, %v621_v45 }
 0x171   : > { %v1482_v51 = vpop.f32.mrf.mxu0 }
 0x172   : > { %704 = vst.msk [vmem:[#allocation2 + $0x18] sm:$0xff] %vm320_vm1, %v703_v49  ;;  %v1483_v52 = vadd.f32 %v1482_v51, %v1481_v48 }
 0x174   : > { %v788_v53 = vadd.f32 %v1483_v52, %v706_v50 }
 0x176   : > { %789 = vst.msk [vmem:[#allocation2 + $0x20] sm:$0xff] %vm320_vm1, %v788_v53 }
 0x179   : > { %v1136_v54 = vld [vmem:[#allocation2 + $0x18] sm:$0xff] }
 0x17a   : > { %1145 = vst.msk [vmem:[%s2222_s20 + $0x18] sm:$0xff] %vm320_vm1, %v1136_v54 }
 0x17d   : > { %v1137_v55 = vld [vmem:[#allocation2 + $0x20] sm:$0xff] }
 0x17e   : > { %1146 = vst.msk [vmem:[%s2222_s20 + $0x20] sm:$0xff] %vm320_vm1, %v1137_v55 }
 0x18d   : > { %v1516_v56 = vpop.f32.mrf.mxu1 }
 0x18f   : > { %v1517_v58 = vpop.f32.mrf.mxu1 }
 0x190   : > { %v1518_v59 = vadd.f32 %v1517_v58, %v1516_v56 }
 0x191   : > { %v1551_v60 = vpop.f32.mrf.mxu0 }
 0x192   : > { %v873_v61 = vadd.f32 %v1518_v59, %v791_v57 }
 0x193   : > { %v1552_v63 = vpop.f32.mrf.mxu0 }
 0x194   : > { %874 = vst.msk [vmem:[#allocation2 + $0x28] sm:$0xff] %vm320_vm1, %v873_v61  ;;  %v1553_v3 = vadd.f32 %v1552_v63, %v1551_v60 }
 0x196   : > { %v958_v4 = vadd.f32 %v1553_v3, %v876_v62 }
 0x198   : > { %959 = vst.msk [vmem:[#allocation2 + $0x30] sm:$0xff] %vm320_vm1, %v958_v4 }
 0x19b   : > { %v1138_v6 = vld [vmem:[#allocation2 + $0x28] sm:$0xff] }
 0x19c   : > { %1147 = vst.msk [vmem:[%s2222_s20 + $0x28] sm:$0xff] %vm320_vm1, %v1138_v6 }
 0x19f   : > { %v1139_v7 = vld [vmem:[#allocation2 + $0x30] sm:$0xff] }
 0x1a0   : > { %1148 = vst.msk [vmem:[%s2222_s20 + $0x30] sm:$0xff] %vm320_vm1, %v1139_v7 }
 0x1ae   : > { %v1586_v36 = vpop.f32.mrf.mxu1 }
 0x1b0   : > { %v1587_v38 = vpop.f32.mrf.mxu1 }
 0x1b1   : > { %v1588_v39 = vadd.f32 %v1587_v38, %v1586_v36 }
 0x1b3   : > { %v1043_v40 = vadd.f32 %v1588_v39, %v961_v37  ;;  %v1621_v41 = vpop.f32.mrf.mxu0 }
 0x1b5   : > { %1044 = vst.msk [vmem:[#allocation2 + $0x38] sm:$0xff] %vm320_vm1, %v1043_v40  ;;  %v1622_v1 = vpop.f32.mrf.mxu0 }
 0x1b6   : > { %v1623_v2 = vadd.f32 %v1622_v1, %v1621_v41 }
 0x1b8   : > { %v1128_v5 = vadd.f32 %v1623_v2, %v1046_v0 }
 0x1ba   : > { %1129 = vst.msk [vmem:[#allocation2 + $0x40] sm:$0xff] %vm320_vm1, %v1128_v5 }
 0x1bc   : > { %v1140_v8 = vld [vmem:[#allocation2 + $0x38] sm:$0xff] }
 0x1bd   : > { %1149 = vst.msk [vmem:[%s2222_s20 + $0x38] sm:$0xff] %vm320_vm1, %v1140_v8 }
 0x1c1   : > { %v1141_v9 = vld [vmem:[#allocation2 + $0x40] sm:$0xff] }
 0x1c2   : > { %1150 = vst.msk [vmem:[%s2222_s20 + $0x40] sm:$0xff] %vm320_vm1, %v1141_v9 }
 0x1c3 PF: > { %s15_s17 = sadd.s32 1, %s1720_s17   ;;  %s2270_s15 = smov %s1716_s16 }
 0x1c4   : > { %p12_p5 = scmp.ge.s32.totalorder %s15_s17, 4   ;;  %s2271_s16 = smov %s2273_s18 }
 0x1c6   :  { %14 = sbr.rel (!%p12_p5) target bundleno = 2 (0x2), region = 96 }

// kernel: convolution_backward_2d.3
= control target key start
LH: loop header
LB: loop body
LE: loop exit
PB: predicated region body
PF: predicated region fallthrough
CT: control target
= control target key end

     0   :  { %s1276_s12 = smov 0   ;;  %s1278_s13 = smov 0   ;;  %s1361_s0 = inlined_call_operand.vmem [shape: f32[2,8,512], index: 0, kind: input, shape index: {}, may-alias: {0,1}]   ;;  %s1362_s1 = inlined_call_operand.vmem [shape: f32[2,8,512], index: 1, kind: input, shape index: {}, may-alias: {0,1}]   ;;  %s1363_s2 = inlined_call_operand.vmem [shape: f32[9,4,8], index: 2, kind: input, shape index: {}]   ;;  %s1364_s3 = inlined_call_operand.vmem [shape: f32[2,4,256], index: 3, kind: output, shape index: {}]  }
   0x1   :  { %s1280_s14 = smov 0  }
   0x2 LB: > { %s25_s15 = sadd.s32 1, %s1241_s13  ;;  %p1159_p0 = scmp.ge.s32.totalorder %s1245_s14, 1  ;;  %s1245_s14 = sphi %s1280_s14, %s13_s14   ;;  %s1241_s13 = sphi %s1278_s13, %s1366_s13   ;;  %s1237_s12 = sphi %s1276_s12, %s1365_s12  }
   0x3   : > { %p27_p1 = scmp.ge.s32.totalorder %s25_s15, 2  ;;  %p179_p2 = scmp.lt.s32.totalorder %s1245_s14, 3 }
   0x5   : > { %s1368_s15 = smov (%p27_p1, %s25_s15), 0  ;;  %p180_p3 = pnand %p1159_p0, %p179_p2 }
   0x6   : > { %p222_p4 = scmp.lt.s32.totalorder (!%p180_p3), %s1237_s12, 1  ;;  %s1248_s24 = smov (!%p180_p3), 1  }
   0x7   : > { %183 = sbr.rel (%p180_p3) target bundleno = 379 (0x17b), region = 32  ;;  %s1249_s25 = smov (!%p180_p3), 2  }
   0x8   : > { %s1250_s28 = smov (!%p180_p3), 16   ;;  %s1251_s29 = smov (!%p180_p3), 17  }
   0x9   : > { %s1252_s30 = smov (!%p180_p3), 18   ;;  %s1253_s4 = smov (!%p180_p3), 32  }
   0xa   : > { %s1254_s5 = smov (!%p180_p3), 33   ;;  %s1255_s6 = smov (!%p180_p3), 34  }
   0xc   : > { %s1370_s12 = smov (!%p222_p4, %s1237_s12), 1  ;;  %v1247_v0 = vmov 0.0   ;;  %vm273_vm0 = vcmask 64512   ;;  %v256_v4 = vld [vmem:[%s1363_s2] sm:$0xf]  ;;  %vm268_vm1 = vcmask 7168  }
   0xd   : > { %341 = vmatprep.mubr.f32.mxu0 %v1247_v0  ;;  %415 = vmatprep.mubr.f32.mxu1 %v1247_v0  ;;  %s1185_s16 = sshll.u32 %s1370_s12, 5  ;;  %v1166_v10 = vld [vmem:[%s1363_s2 + $0x4] sm:$0xf]  ;;  %vm430_vm2 = vcmask 15360   ;;  %v1169_v15 = vld [vmem:[%s1363_s2 + $0x8] sm:$0xf] }
   0xe   : > { %s229_s19 = scalar_lea.vmem %s1361_s0, %s1185_s16  ;;  %s1187_s20 = sadd.s32 16, %s1185_s16  ;;  %vm519_vm3 = vcmask 130048   ;;  %v1171_v22 = vld [vmem:[%s1363_s2 + $0xc] sm:$0xf]  ;;  %vm608_vm4 = vcmask 138240   ;;  %vm697_vm5 = vcmask 146432  }
   0xf   : > { %s240_s23 = scalar_lea.vmem %s1362_s1, %s1187_s20  ;;  %v253_v1 = vld [vmem:[%s229_s19 + $0x8] sm:$0xff]  ;;  %v1173_v27 = vld [vmem:[%s1363_s2 + $0x10] sm:$0xf]  ;;  %v1175_v34 = vld [vmem:[%s1363_s2 + $0x14] sm:$0xf]  ;;  %vm786_vm6 = vcmask 261120  }
  0x10   : > { %v254_v2 = vld [vmem:[%s240_s23] sm:$0xff]  ;;  %v255_v3 = vld [vmem:[%s240_s23 + $0x8] sm:$0xff]  ;;  %262 = vrot.lane.b32.xlu1 %v253_v1, %s1248_s24  ;;  %v1177_v39 = vld [vmem:[%s1363_s2 + $0x18] sm:$0xf]  ;;  %vm875_vm7 = vcmask 269312   ;;  %vm964_vm8 = vcmask 277504  }
  0x11   : > { %264 = vrot.lane.b32.xlu0 %v254_v2, %s1248_s24  ;;  %381 = vmatprep.subr.mxu1 %v255_v3  ;;  %v1179_v46 = vld [vmem:[%s1363_s2 + $0x1c] sm:$0xf]  ;;  %v1181_v51 = vld [vmem:[%s1363_s2 + $0x20] sm:$0xf]  ;;  %s1188_s27 = sshll.u32 %s1370_s12, 3 }
  0x12   : > { %382 = vmatpush1.msra.mxu1 %v254_v2 }
  0x13   : > { %1168 = vmatmul.mubr.msk.f32.vlgmr.msra.gmra.mxu1 %vm273_vm0, %v256_v4 }
  0x14   : > { %424 = vrot.lane.b32.xlu1 %v253_v1, %s1249_s25  ;;  %591 = vmatprep.mubr.f32.mxu1 %v1247_v0 }
  0x15   : > { %266 = vrot.lane.b32.xlu0 %v255_v3, %s1248_s24 }
  0x18   : > { %426 = vrot.lane.b32.xlu1 %v254_v2, %s1249_s25 }
  0x19   : > { %428 = vrot.lane.b32.xlu0 %v255_v3, %s1249_s25 }
  0x1c   : > { %517 = vrot.lane.b32.xlu1 %v255_v3, %s1250_s28 }
  0x1d   : > { %515 = vrot.lane.b32.xlu0 %v254_v2, %s1250_s28 }
  0x20   : > { %604 = vrot.lane.b32.xlu1 %v254_v2, %s1251_s29 }
  0x21   : > { %513 = vrot.lane.b32.xlu0 %v253_v1, %s1250_s28 }
  0x24   : > { %602 = vrot.lane.b32.xlu1 %v253_v1, %s1251_s29 }
  0x25   : > { %606 = vrot.lane.b32.xlu0 %v255_v3, %s1251_s29 }
  0x28   : > { %695 = vrot.lane.b32.xlu1 %v255_v3, %s1252_s30 }
  0x29   : > { %693 = vrot.lane.b32.xlu0 %v254_v2, %s1252_s30 }
  0x2c   : > { %782 = vrot.lane.b32.xlu1 %v254_v2, %s1253_s4 }
  0x2d   : > { %691 = vrot.lane.b32.xlu0 %v253_v1, %s1252_s30  ;;  %s251_s30 = scalar_lea.vmem %s1364_s3, %s1188_s27 }
  0x30   : > { %780 = vrot.lane.b32.xlu1 %v253_v1, %s1253_s4 }
  0x31   : > { %784 = vrot.lane.b32.xlu0 %v255_v3, %s1253_s4 }
  0x34   : > { %873 = vrot.lane.b32.xlu1 %v255_v3, %s1254_s5 }
  0x35   : > { %871 = vrot.lane.b32.xlu0 %v254_v2, %s1254_s5 }
  0x38   : > { %960 = vrot.lane.b32.xlu1 %v254_v2, %s1255_s6 }
  0x39   : > { %869 = vrot.lane.b32.xlu0 %v253_v1, %s1254_s5 }
  0x3c   : > { %958 = vrot.lane.b32.xlu1 %v253_v1, %s1255_s6 }
  0x3d   : > { %962 = vrot.lane.b32.xlu0 %v255_v3, %s1255_s6 }
  0x82   : > { %v263_v5 = vpop.permute.xlu1 %262 }
  0x83   : > { %v265_v6 = vpop.permute.xlu0 %264 }
  0x84   : > { %v269_v11 = vsel %vm268_vm1, %v263_v5, %v265_v6 }
  0x86   : > { %v425_v7 = vpop.permute.xlu1 %424 }
  0x87   : > { %v267_v8 = vpop.permute.xlu0 %266 }
  0x88   : > { %v270_v9 = vsel %vm268_vm1, %v265_v6, %v267_v8 }
  0x89   : > { %307 = vmatprep.subr.mxu0 %v270_v9 }
  0x8a   : > { %308 = vmatpush1.msra.mxu0 %v269_v11  ;;  %v427_v12 = vpop.permute.xlu1 %426 }
  0x8b   : > { %v429_v13 = vpop.permute.xlu0 %428  ;;  %1167 = vmatmul.mubr.msk.f32.vlgmr.msra.gmra.mxu0 %vm273_vm0, %v1166_v10  ;;  %v431_v16 = vsel %vm430_vm2, %v425_v7, %v427_v12 }
  0x8c   : > { %v432_v14 = vsel %vm430_vm2, %v427_v12, %v429_v13  ;;  %502 = vmatprep.mubr.f32.mxu0 %v1247_v0 }
  0x8d   : > { %468 = vmatprep.subr.mxu0 %v432_v14 }
  0x8e   : > { %469 = vmatpush1.msra.mxu0 %v431_v16  ;;  %v518_v17 = vpop.permute.xlu1 %517 }
  0x8f   : > { %v516_v18 = vpop.permute.xlu0 %515  ;;  %1170 = vmatmul.mubr.msk.f32.vlgmr.msra.gmra.mxu0 %vm273_vm0, %v1169_v15 }
  0x90   : > { %v521_v19 = vsel %vm519_vm3, %v516_v18, %v518_v17  ;;  %680 = vmatprep.mubr.f32.mxu0 %v1247_v0 }
  0x91   : > { %557 = vmatprep.subr.mxu1 %v521_v19 }
  0x92   : > { %v605_v20 = vpop.permute.xlu1 %604 }
  0x93   : > { %v514_v21 = vpop.permute.xlu0 %513 }
  0x94   : > { %v520_v23 = vsel %vm519_vm3, %v514_v21, %v516_v18 }
  0x95   : > { %558 = vmatpush1.msra.mxu1 %v520_v23 }
  0x96   : > { %v603_v24 = vpop.permute.xlu1 %602  ;;  %1172 = vmatmul.mubr.msk.f32.vlgmr.msra.gmra.mxu1 %vm273_vm0, %v1171_v22 }
  0x97   : > { %v607_v25 = vpop.permute.xlu0 %606  ;;  %769 = vmatprep.mubr.f32.mxu1 %v1247_v0  ;;  %v609_v28 = vsel %vm608_vm4, %v603_v24, %v605_v20 }
  0x98   : > { %v610_v26 = vsel %vm608_vm4, %v605_v20, %v607_v25 }
  0x99   : > { %646 = vmatprep.subr.mxu0 %v610_v26 }
  0x9a   : > { %647 = vmatpush1.msra.mxu0 %v609_v28  ;;  %v696_v29 = vpop.permute.xlu1 %695 }
  0x9b   : > { %v694_v30 = vpop.permute.xlu0 %693  ;;  %1174 = vmatmul.mubr.msk.f32.vlgmr.msra.gmra.mxu0 %vm273_vm0, %v1173_v27 }
  0x9c   : > { %v699_v31 = vsel %vm697_vm5, %v694_v30, %v696_v29  ;;  %858 = vmatprep.mubr.f32.mxu0 %v1247_v0 }
  0x9d   : > { %735 = vmatprep.subr.mxu1 %v699_v31 }
  0x9e   : > { %v783_v32 = vpop.permute.xlu1 %782 }
  0x9f   : > { %v692_v33 = vpop.permute.xlu0 %691 }
  0xa0   : > { %v698_v35 = vsel %vm697_vm5, %v692_v33, %v694_v30 }
  0xa1   : > { %736 = vmatpush1.msra.mxu1 %v698_v35 }
  0xa2   : > { %v781_v36 = vpop.permute.xlu1 %780  ;;  %1176 = vmatmul.mubr.msk.f32.vlgmr.msra.gmra.mxu1 %vm273_vm0, %v1175_v34 }
  0xa3   : > { %v785_v37 = vpop.permute.xlu0 %784  ;;  %947 = vmatprep.mubr.f32.mxu1 %v1247_v0  ;;  %v787_v40 = vsel %vm786_vm6, %v781_v36, %v783_v32 }
  0xa4   : > { %v788_v38 = vsel %vm786_vm6, %v783_v32, %v785_v37 }
  0xa5   : > { %824 = vmatprep.subr.mxu0 %v788_v38 }
  0xa6   : > { %825 = vmatpush1.msra.mxu0 %v787_v40  ;;  %v874_v41 = vpop.permute.xlu1 %873 }
  0xa7   : > { %v872_v42 = vpop.permute.xlu0 %871  ;;  %1178 = vmatmul.mubr.msk.f32.vlgmr.msra.gmra.mxu0 %vm273_vm0, %v1177_v39 }
  0xa8   : > { %v877_v43 = vsel %vm875_vm7, %v872_v42, %v874_v41  ;;  %1036 = vmatprep.mubr.f32.mxu0 %v1247_v0 }
  0xa9   : > { %913 = vmatprep.subr.mxu1 %v877_v43 }
  0xaa   : > { %v961_v44 = vpop.permute.xlu1 %960 }
  0xab   : > { %v870_v45 = vpop.permute.xlu0 %869 }
  0xac   : > { %v876_v47 = vsel %vm875_vm7, %v870_v45, %v872_v42 }
  0xad   : > { %914 = vmatpush1.msra.mxu1 %v876_v47 }
  0xae   : > { %v959_v48 = vpop.permute.xlu1 %958  ;;  %1180 = vmatmul.mubr.msk.f32.vlgmr.msra.gmra.mxu1 %vm273_vm0, %v1179_v46 }
  0xaf   : > { %v963_v49 = vpop.permute.xlu0 %962  ;;  %v965_v52 = vsel %vm964_vm8, %v959_v48, %v961_v44 }
  0xb0   : > { %v966_v50 = vsel %vm964_vm8, %v961_v44, %v963_v49 }
  0xb1   : > { %1002 = vmatprep.subr.mxu0 %v966_v50 }
  0xb2   : > { %1003 = vmatpush1.msra.mxu0 %v965_v52 }
  0xb3   : > { %1182 = vmatmul.mubr.msk.f32.vlgmr.msra.gmra.mxu0 %vm273_vm0, %v1181_v51 }
  0xd3   : > { %v417_v55 = vpop.f32.mrf.mxu1 }
  0xd5   : > { %v419_v56 = vpop.f32.mrf.mxu1 }
 0x14b   : > { %v343_v53 = vpop.f32.mrf.mxu0 }
 0x14c   : > { %v418_v58 = vadd.f32 %v417_v55, %v343_v53 }
 0x14d   : > { %v345_v54 = vpop.f32.mrf.mxu0 }
 0x14e   : > { %v420_v59 = vadd.f32 %v419_v56, %v345_v54 }
 0x14f   : > { %v504_v57 = vpop.f32.mrf.mxu0 }
 0x150   : > { %v509_v62 = vadd.f32 %v504_v57, %v418_v58 }
 0x151   : > { %v506_v60 = vpop.f32.mrf.mxu0 }
 0x152   : > { %v510_v63 = vadd.f32 %v506_v60, %v420_v59 }
 0x156   : > { %v593_v61 = vpop.f32.mrf.mxu1 }
 0x157   : > { %v598_v2 = vadd.f32 %v593_v61, %v509_v62 }
 0x158   : > { %v595_v0 = vpop.f32.mrf.mxu1 }
 0x159   : > { %v599_v3 = vadd.f32 %v595_v0, %v510_v63 }
 0x15b   : > { %v682_v1 = vpop.f32.mrf.mxu0 }
 0x15c   : > { %v687_v6 = vadd.f32 %v682_v1, %v598_v2 }
 0x15d   : > { %v684_v4 = vpop.f32.mrf.mxu0 }
 0x15e   : > { %v688_v7 = vadd.f32 %v684_v4, %v599_v3 }
 0x162   : > { %v771_v5 = vpop.f32.mrf.mxu1 }
 0x163   : > { %v776_v10 = vadd.f32 %v771_v5, %v687_v6 }
 0x164   : > { %v773_v8 = vpop.f32.mrf.mxu1 }
 0x165   : > { %v777_v11 = vadd.f32 %v773_v8, %v688_v7 }
 0x167   : > { %v860_v9 = vpop.f32.mrf.mxu0 }
 0x168   : > { %v865_v14 = vadd.f32 %v860_v9, %v776_v10 }
 0x169   : > { %v862_v12 = vpop.f32.mrf.mxu0 }
 0x16a   : > { %v866_v15 = vadd.f32 %v862_v12, %v777_v11 }
 0x16e   : > { %v949_v13 = vpop.f32.mrf.mxu1 }
 0x16f   : > { %v954_v18 = vadd.f32 %v949_v13, %v865_v14 }
 0x170   : > { %v951_v16 = vpop.f32.mrf.mxu1 }
 0x171   : > { %v955_v19 = vadd.f32 %v951_v16, %v866_v15 }
 0x173   : > { %v1038_v17 = vpop.f32.mrf.mxu0 }
 0x174   : > { %v1043_v21 = vadd.f32 %v1038_v17, %v954_v18 }
 0x175   : > { %v1040_v20 = vpop.f32.mrf.mxu0 }
 0x176   : > { %v1044_v22 = vadd.f32 %v1040_v20, %v955_v19 }
 0x178   : > { %v1047_v23 = vcombine.low %v1043_v21, %v1044_v22 }
 0x17a   : > { %1049 = vst [vmem:[%s251_s30] sm:$0xff] %v1047_v23 }
 0x17b PF: > { %s13_s14 = sadd.s32 1, %s1245_s14   ;;  %s1365_s12 = smov %s1241_s13 }
 0x17c   : > { %p10_p5 = scmp.ge.s32.totalorder %s13_s14, 4   ;;  %s1366_s13 = smov %s1368_s15 }
 0x17e   :  { %12 = sbr.rel (!%p10_p5) target bundleno = 2 (0x2), region = 73 }

</bundles_post_ra>
